<compile_context>
chip_gen: v5e
topology: v5e:2x2
jax: 0.10.0
libtpu: 0.0.40
codegen_flags: <defaults>
</compile_context>

<pallas_src>
import functools

import jax
import jax.numpy as jnp
import numpy as np
from jax.experimental import pallas as pl
from jax.experimental.pallas import tpu as pltpu


def _round_up(x, m):
    return (x + m - 1) // m * m


def _device_kind():
    try:
        return jax.devices()[0].device_kind.lower()
    except Exception:
        return ""


def _linear_plan(F):
    """Pick the Linear-1 K tile, scoped-VMEM limit and TensorCore column split."""
    kind = _device_kind()
    if F < 2048:
        tk = 128                      # toy shapes
    elif "v5" in kind:
        tk = 2048                     # largest tile under v5e's 16 MiB default scoped VMEM
    else:
        tk = 8192                     # v6e / v7x: ~16 MiB bf16 w3 blocks
    tk = min(tk, _round_up(F, 128))
    vmem_limit = (48 << 20) if tk >= 4096 else None
    n_split = 2 if "7" in kind else 1  # v7x: 2 TensorCores per chip
    return tk, vmem_limit, n_split


# ---------------------------------------------------------------------------
# Kernel 1: conv1 (+ReLU + fused MaxPool) -> conv2 (+ReLU) -> flatten (+pad)
# ---------------------------------------------------------------------------
def conv_stack_kernel(xe_ref, xo_ref, w1_ref, b1_ref, w2_ref, b2_ref, f_ref):
    H = w1_ref.shape[-1]
    B, F_pad = f_ref.shape
    Lp = xe_ref.shape[0] // B          # pooled length
    L2 = Lp - 2                        # conv2 output length
    F = L2 * H

    # conv1 as one tap-fused matmul per (even/odd) output-position set,
    # bias + ReLU, MaxPool1d(2) folded into the epilogue as max(even, odd).
    ye = jnp.dot(xe_ref[...], w1_ref[...], preferred_element_type=jnp.float32) + b1_ref[...]
    yo = jnp.dot(xo_ref[...], w1_ref[...], preferred_element_type=jnp.float32) + b1_ref[...]
    p1 = jnp.maximum(jnp.maximum(ye, yo), 0.0).reshape(B, Lp, H)   # (B, Lp, H)

    # conv2 (k=3, pad=0): three accumulated (B*L2, H)@(H, H) dots on contiguous
    # shifted views (avoids the lane-axis tap concat / XLU relayout copies).
    y2 = jnp.zeros((B * L2, H), jnp.float32)
    for k in range(3):
        tap = p1[:, k:k + L2, :].reshape(B * L2, H)
        y2 = y2 + jnp.dot(tap, w2_ref[k * H:(k + 1) * H, :],
                          preferred_element_type=jnp.float32)
    y2 = jnp.maximum(y2.reshape(B, L2, H) + b2_ref[...], 0.0)

    # Flatten (channels-last (l, c) order; w3 rows were permuted at init to
    # match) in the Linear-1 streaming dtype; zero-fill the F_pad tail without
    # materializing a concat temporary.
    flat = y2.reshape(B, F).astype(f_ref.dtype)
    if F_pad > F:
        f_ref[...] = jnp.zeros((B, F_pad), f_ref.dtype)
    f_ref[:, :F] = flat


# ---------------------------------------------------------------------------
# Kernel 2: Linear(F -> 1024) + ReLU (+ eval-mode Dropout) + Linear(1024 -> O)
# grid = (output-column split [parallel], F reduction [arbitrary, innermost]).
# ---------------------------------------------------------------------------
def linear_stack_kernel(f_ref, w3_ref, b3_ref, w4_ref, b4_ref, out_ref, acc_ref):
    j = pl.program_id(0)               # column-split index (1 or 2 blocks)
    k = pl.program_id(1)               # F reduction step

    @pl.when(k == 0)
    def _():
        acc_ref[...] = jnp.zeros_like(acc_ref)

    # f and w3 share the streaming dtype -> no per-step cast in the hot loop.
    acc_ref[...] += jnp.dot(f_ref[...], w3_ref[...],
                            preferred_element_type=jnp.float32)

    @pl.when(k == pl.num_programs(1) - 1)
    def _():
        h = jnp.maximum(acc_ref[...] + b3_ref[...], 0.0)
        # Dropout(0.5) is identity in eval mode.
        # TODO(synk): training-mode dropout (pltpu.prng_*) not implemented.
        part = jnp.dot(h.astype(w4_ref.dtype), w4_ref[...],
                       preferred_element_type=jnp.float32)
        # Add the classifier bias only in the j==0 partial so the wrapper's sum
        # over column splits counts it exactly once.
        part = part + b4_ref[...] * (j == 0).astype(jnp.float32)
        out_ref[0] = part.astype(out_ref.dtype)


# ---------------------------------------------------------------------------
# One-time (init) weight repacking -- NOT in the per-call path.
# ---------------------------------------------------------------------------
def prepare_params(params, *, linear_weight_dtype=jnp.bfloat16):
    (conv1_w, conv1_b, conv2_w, conv2_b, lin1_w, lin1_b, cls_w, cls_b) = params
    H, Cin, _ = conv1_w.shape
    N1, F = lin1_w.shape
    O = cls_w.shape[0]
    L2 = F // H

    tk, vmem_limit, n_split = _linear_plan(F)
    F_pad = _round_up(F, tk)

    w1col = jnp.transpose(conv1_w, (2, 1, 0)).reshape(3 * Cin, H)   # rows: (k, c)
    b1 = conv1_b.reshape(1, H)
    w2col = jnp.transpose(conv2_w, (2, 1, 0)).reshape(3 * H, H)
    b2 = conv2_b.reshape(1, H)

    # PyTorch Flatten of (B, H, L2) indexes rows as c*L2 + l; the conv kernel
    # flattens (B, L2, H) as l*H + c, so permute W1^T rows to match, zero-pad to
    # F_pad and cast to the streaming dtype -- once, at init (this is the ~1 GiB
    # transpose/pad/cast that previously ran every forward call).
    w3 = jnp.transpose(lin1_w.T.reshape(H, L2, N1), (1, 0, 2)).reshape(F, N1)
    w3 = jnp.pad(w3, ((0, F_pad - F), (0, 0))).astype(linear_weight_dtype)
    b3 = lin1_b.reshape(1, N1).astype(jnp.float32)
    w4 = cls_w.T.astype(linear_weight_dtype)                         # (1024, O)
    b4 = cls_b.reshape(1, O).astype(jnp.float32)

    packed = (w1col, b1, w2col, b2, w3, b3, w4, b4)
    packed = tuple(jax.block_until_ready(a) for a in packed)
    meta = dict(tk=tk, vmem_limit=vmem_limit, n_split=n_split)
    return packed, meta


# ---------------------------------------------------------------------------
# Per-call forward
# ---------------------------------------------------------------------------
@functools.partial(jax.jit, static_argnames=("tk", "vmem_limit", "n_split"))
def _forward_impl(x_ncl, w1col, b1, w2col, b2, w3, b3, w4, b4, *,
                  tk, vmem_limit, n_split):
    B, Cin, L = x_ncl.shape
    assert L % 2 == 0, "MaxPool1d(2) even/odd fusion requires an even length L"
    H = w1col.shape[-1]
    Lp = L // 2
    L2 = Lp - 2
    F = H * L2
    F_pad, N1 = w3.shape
    O = w4.shape[-1]
    assert F <= F_pad and F_pad % tk == 0 and N1 % n_split == 0
    act_dtype = w3.dtype

    # conv1 im2col (pad=1, k=3), split even/odd output positions (plain XLA glue;
    # depends on x, so it stays in the per-call path -- it is tiny).
    x_nlc = jnp.transpose(x_ncl, (0, 2, 1))                       # (B, L, Cin)
    xp = jnp.pad(x_nlc, ((0, 0), (1, 1), (0, 0)))
    taps = jnp.concatenate([xp[:, k:k + L, :] for k in range(3)], axis=-1)
    xcol_even = taps[:, 0::2, :].reshape(B * Lp, 3 * Cin)
    xcol_odd = taps[:, 1::2, :].reshape(B * Lp, 3 * Cin)

    # ---- kernel 1: conv stage (small, full-array VMEM blocks) ----
    vmem = pl.BlockSpec(memory_space=pltpu.MemorySpace.VMEM)
    f = pl.pallas_call(
        conv_stack_kernel,
        out_shape=jax.ShapeDtypeStruct((B, F_pad), act_dtype),
        in_specs=[vmem] * 6,
        out_specs=vmem,
    )(xcol_even, xcol_odd, w1col, b1, w2col, b2)

    # ---- kernel 2: Linear1 + classifier, streamed over F, split over columns ----
    Nc = N1 // n_split
    w_bytes = jnp.dtype(act_dtype).itemsize
    cost = pl.CostEstimate(
        flops=2 * B * F_pad * N1 + 2 * B * N1 * O,
        transcendentals=0,
        bytes_accessed=(F_pad * N1 * w_bytes + n_split * B * F_pad * w_bytes
                        + N1 * O * w_bytes + n_split * B * O * 4),
    )
    cparams = dict(dimension_semantics=("parallel", "arbitrary"))
    if vmem_limit is not None:
        cparams["vmem_limit_bytes"] = vmem_limit
    parts = pl.pallas_call(
        linear_stack_kernel,
        out_shape=jax.ShapeDtypeStruct((n_split, B, O), jnp.float32),
        grid_spec=pltpu.PrefetchScalarGridSpec(
            num_scalar_prefetch=0,
            grid=(n_split, F_pad // tk),
            in_specs=[
                pl.BlockSpec((B, tk), lambda j, k: (0, k)),    # activation slice
                pl.BlockSpec((tk, Nc), lambda j, k: (k, j)),   # w3 block (streamed)
                pl.BlockSpec((1, Nc), lambda j, k: (0, j)),    # b3 column slice
                pl.BlockSpec((Nc, O), lambda j, k: (j, 0)),    # w4 row slice
                pl.BlockSpec((1, O), lambda j, k: (0, 0)),     # b4
            ],
            out_specs=pl.BlockSpec((1, B, O), lambda j, k: (j, 0, 0)),
            scratch_shapes=[pltpu.VMEM((B, Nc), jnp.float32)],
        ),
        compiler_params=pltpu.CompilerParams(**cparams),
        cost_estimate=cost,
    )(f, w3, b3, w4, b4)
    return parts.sum(axis=0) if n_split > 1 else parts[0]


def url_net_forward(x_ncl, packed, meta):
    """x_ncl: (B, Cin, L) float32 (PyTorch NCL layout); packed/meta from prepare_params."""
    return _forward_impl(x_ncl, *packed, tk=meta["tk"],
                         vmem_limit=meta["vmem_limit"], n_split=meta["n_split"])


# ---------------------------------------------------------------------------
# Plain-JAX replica of the PyTorch forward (NCL layout) for validation.
# ---------------------------------------------------------------------------
def reference_forward(x_ncl, params):
    (conv1_w, conv1_b, conv2_w, conv2_b,
     lin1_w, lin1_b, cls_w, cls_b) = params
    dn = ("NCH", "OIH", "NCH")
    y = jax.lax.conv_general_dilated(x_ncl, conv1_w, (1,), [(1, 1)],
                                     dimension_numbers=dn)
    y = jax.nn.relu(y + conv1_b[None, :, None])
    B, H, L = y.shape
    y = y.reshape(B, H, L // 2, 2).max(axis=-1)                   # MaxPool1d(2)
    z = jax.lax.conv_general_dilated(y, conv2_w, (1,), [(0, 0)],
                                     dimension_numbers=dn)
    z = jax.nn.relu(z + conv2_b[None, :, None])
    f = z.reshape(B, -1)                                          # (B, H*L2)
    h = jax.nn.relu(f @ lin1_w.T + lin1_b)                        # dropout: eval
    return h @ cls_w.T + cls_b


def make_params(key, Cin, H, L, O):
    Lp = L // 2
    L2 = Lp - 2
    F = H * L2
    ks = jax.random.split(key, 8)
    conv1_w = 0.1 * jax.random.normal(ks[0], (H, Cin, 3), jnp.float32)
    conv1_b = 0.1 * jax.random.normal(ks[1], (H,), jnp.float32)
    conv2_w = 0.1 * jax.random.normal(ks[2], (H, H, 3), jnp.float32)
    conv2_b = 0.1 * jax.random.normal(ks[3], (H,), jnp.float32)
    lin1_w = 0.05 * jax.random.normal(ks[4], (1024, F), jnp.float32)
    lin1_b = 0.05 * jax.random.normal(ks[5], (1024,), jnp.float32)
    cls_w = 0.05 * jax.random.normal(ks[6], (O, 1024), jnp.float32)
    cls_b = 0.05 * jax.random.normal(ks[7], (O,), jnp.float32)
    return (conv1_w, conv1_b, conv2_w, conv2_b, lin1_w, lin1_b, cls_w, cls_b)


if __name__ == "__main__":
    B, Cin, L, H, O = 2, 4, 16, 32, 8
    key = jax.random.PRNGKey(0)
    kx, kp = jax.random.split(key)
    x = jax.random.normal(kx, (B, Cin, L), jnp.float32)   # PyTorch NCL input
    params = make_params(kp, Cin, H, L, O)

    ref = jax.block_until_ready(reference_forward(x, params))

    # Exact-semantics path (f32 linear weights): tight tolerance.
    packed_f32, meta_f32 = prepare_params(params, linear_weight_dtype=jnp.float32)
    out_f32 = jax.block_until_ready(url_net_forward(x, packed_f32, meta_f32))
    np.testing.assert_allclose(np.asarray(out_f32), np.asarray(ref),
                               rtol=1e-4, atol=1e-4)

    # Performance path (bf16-streamed Linear weights + bf16 activation handoff,
    # f32 accumulation) -- relaxed tolerance is the documented accuracy knob.
    packed_bf16, meta_bf16 = prepare_params(params, linear_weight_dtype=jnp.bfloat16)
    out_bf16 = jax.block_until_ready(url_net_forward(x, packed_bf16, meta_bf16))
    np.testing.assert_allclose(np.asarray(out_bf16), np.asarray(ref),
                               rtol=3e-2, atol=3e-2)

    print("KERNEL_OK")
</pallas_src>

<mosaic_0001>
module attributes {stable_mosaic.version = 11 : i64} {
  func.func @conv_stack_kernel(%arg0: memref<16x12xf32, #tpu.memory_space<vmem>>, %arg1: memref<16x12xf32, #tpu.memory_space<vmem>>, %arg2: memref<12x32xf32, #tpu.memory_space<vmem>>, %arg3: memref<1x32xf32, #tpu.memory_space<vmem>>, %arg4: memref<96x32xf32, #tpu.memory_space<vmem>>, %arg5: memref<1x32xf32, #tpu.memory_space<vmem>>, %arg6: memref<2x256xf32, #tpu.memory_space<vmem>>) attributes {dimension_semantics = [], scalar_prefetch = 0 : i64, scratch_operands = 0 : i64, tpu.core_type = #tpu.core_type<tc>} {
    %c0 = arith.constant 0 : index
    %c0_0 = arith.constant 0 : index
    %0 = vector.load %arg0[%c0, %c0_0] : memref<16x12xf32, #tpu.memory_space<vmem>>, vector<16x12xf32>
    %c0_1 = arith.constant 0 : index
    %c0_2 = arith.constant 0 : index
    %1 = vector.load %arg2[%c0_1, %c0_2] : memref<12x32xf32, #tpu.memory_space<vmem>>, vector<12x32xf32>
    %cst = arith.constant dense<0.000000e+00> : vector<16x32xf32>
    %2 = tpu.matmul %0, %1, %cst {dimension_numbers = #tpu.dot_dimension_numbers<[1], [0], [0], [1], [0, 0, 1, 1], [], []>} : vector<16x12xf32>, vector<12x32xf32>, vector<16x32xf32> -> vector<16x32xf32>
    %c0_3 = arith.constant 0 : index
    %c0_4 = arith.constant 0 : index
    %3 = vector.load %arg3[%c0_3, %c0_4] : memref<1x32xf32, #tpu.memory_space<vmem>>, vector<1x32xf32>
    %4 = vector.broadcast %3 : vector<1x32xf32> to vector<16x32xf32>
    %5 = arith.addf %2, %4 : vector<16x32xf32>
    %c0_5 = arith.constant 0 : index
    %c0_6 = arith.constant 0 : index
    %6 = vector.load %arg1[%c0_5, %c0_6] : memref<16x12xf32, #tpu.memory_space<vmem>>, vector<16x12xf32>
    %c0_7 = arith.constant 0 : index
    %c0_8 = arith.constant 0 : index
    %7 = vector.load %arg2[%c0_7, %c0_8] : memref<12x32xf32, #tpu.memory_space<vmem>>, vector<12x32xf32>
    %cst_9 = arith.constant dense<0.000000e+00> : vector<16x32xf32>
    %8 = tpu.matmul %6, %7, %cst_9 {dimension_numbers = #tpu.dot_dimension_numbers<[1], [0], [0], [1], [0, 0, 1, 1], [], []>} : vector<16x12xf32>, vector<12x32xf32>, vector<16x32xf32> -> vector<16x32xf32>
    %c0_10 = arith.constant 0 : index
    %c0_11 = arith.constant 0 : index
    %9 = vector.load %arg3[%c0_10, %c0_11] : memref<1x32xf32, #tpu.memory_space<vmem>>, vector<1x32xf32>
    %10 = vector.broadcast %9 : vector<1x32xf32> to vector<16x32xf32>
    %11 = arith.addf %8, %10 : vector<16x32xf32>
    %12 = arith.maximumf %5, %11 : vector<16x32xf32>
    %cst_12 = arith.constant 0.000000e+00 : f32
    %13 = vector.broadcast %cst_12 : f32 to vector<16x32xf32>
    %14 = arith.maximumf %12, %13 : vector<16x32xf32>
    %15 = vector.shape_cast %14 : vector<16x32xf32> to vector<2x8x32xf32>
    %cst_13 = arith.constant 0.000000e+00 : f32
    %16 = vector.broadcast %cst_13 : f32 to vector<12x32xf32>
    %17 = vector.extract_strided_slice %15 {offsets = [0, 0, 0], sizes = [2, 6, 32], strides = [1, 1, 1]} : vector<2x8x32xf32> to vector<2x6x32xf32>
    %18 = vector.shape_cast %17 : vector<2x6x32xf32> to vector<12x32xf32>
    %c0_14 = arith.constant 0 : index
    %c0_15 = arith.constant 0 : index
    %19 = vector.load %arg4[%c0_14, %c0_15] : memref<96x32xf32, #tpu.memory_space<vmem>>, vector<32x32xf32>
    %cst_16 = arith.constant dense<0.000000e+00> : vector<12x32xf32>
    %20 = tpu.matmul %18, %19, %cst_16 {dimension_numbers = #tpu.dot_dimension_numbers<[1], [0], [0], [1], [0, 0, 1, 1], [], []>} : vector<12x32xf32>, vector<32x32xf32>, vector<12x32xf32> -> vector<12x32xf32>
    %21 = arith.addf %16, %20 : vector<12x32xf32>
    %22 = vector.extract_strided_slice %15 {offsets = [0, 1, 0], sizes = [2, 6, 32], strides = [1, 1, 1]} : vector<2x8x32xf32> to vector<2x6x32xf32>
    %23 = vector.shape_cast %22 : vector<2x6x32xf32> to vector<12x32xf32>
    %c32 = arith.constant 32 : index
    %c0_17 = arith.constant 0 : index
    %24 = vector.load %arg4[%c32, %c0_17] : memref<96x32xf32, #tpu.memory_space<vmem>>, vector<32x32xf32>
    %cst_18 = arith.constant dense<0.000000e+00> : vector<12x32xf32>
    %25 = tpu.matmul %23, %24, %cst_18 {dimension_numbers = #tpu.dot_dimension_numbers<[1], [0], [0], [1], [0, 0, 1, 1], [], []>} : vector<12x32xf32>, vector<32x32xf32>, vector<12x32xf32> -> vector<12x32xf32>
    %26 = arith.addf %21, %25 : vector<12x32xf32>
    %27 = vector.extract_strided_slice %15 {offsets = [0, 2, 0], sizes = [2, 6, 32], strides = [1, 1, 1]} : vector<2x8x32xf32> to vector<2x6x32xf32>
    %28 = vector.shape_cast %27 : vector<2x6x32xf32> to vector<12x32xf32>
    %c64 = arith.constant 64 : index
    %c0_19 = arith.constant 0 : index
    %29 = vector.load %arg4[%c64, %c0_19] : memref<96x32xf32, #tpu.memory_space<vmem>>, vector<32x32xf32>
    %cst_20 = arith.constant dense<0.000000e+00> : vector<12x32xf32>
    %30 = tpu.matmul %28, %29, %cst_20 {dimension_numbers = #tpu.dot_dimension_numbers<[1], [0], [0], [1], [0, 0, 1, 1], [], []>} : vector<12x32xf32>, vector<32x32xf32>, vector<12x32xf32> -> vector<12x32xf32>
    %31 = arith.addf %26, %30 : vector<12x32xf32>
    %32 = vector.shape_cast %31 : vector<12x32xf32> to vector<2x6x32xf32>
    %c0_21 = arith.constant 0 : index
    %c0_22 = arith.constant 0 : index
    %33 = vector.load %arg5[%c0_21, %c0_22] : memref<1x32xf32, #tpu.memory_space<vmem>>, vector<1x32xf32>
    %34 = vector.shape_cast %33 : vector<1x32xf32> to vector<1x1x32xf32>
    %35 = vector.broadcast %34 : vector<1x1x32xf32> to vector<2x6x32xf32>
    %36 = arith.addf %32, %35 : vector<2x6x32xf32>
    %cst_23 = arith.constant 0.000000e+00 : f32
    %37 = vector.broadcast %cst_23 : f32 to vector<2x6x32xf32>
    %38 = arith.maximumf %36, %37 : vector<2x6x32xf32>
    %39 = vector.shape_cast %38 : vector<2x6x32xf32> to vector<2x192xf32>
    %cst_24 = arith.constant 0.000000e+00 : f32
    %40 = vector.broadcast %cst_24 : f32 to vector<2x256xf32>
    %c0_25 = arith.constant 0 : index
    %c0_26 = arith.constant 0 : index
    %41 = vector.load %arg6[%c0_25, %c0_26] : memref<2x256xf32, #tpu.memory_space<vmem>>, vector<2x256xf32>
    tpu.vector_store %arg6[%c0_25, %c0_26], %40 {strides = array<i32>} : memref<2x256xf32, #tpu.memory_space<vmem>>, vector<2x256xf32>,
    %c0_27 = arith.constant 0 : index
    %c0_28 = arith.constant 0 : index
    %42 = vector.load %arg6[%c0_27, %c0_28] : memref<2x256xf32, #tpu.memory_space<vmem>>, vector<2x192xf32>
    tpu.vector_store %arg6[%c0_27, %c0_28], %39 {strides = array<i32>} : memref<2x256xf32, #tpu.memory_space<vmem>>, vector<2x192xf32>,
    return
  }
}

module attributes {stable_mosaic.version = 11 : i64} {
  func.func @linear_stack_kernel(%arg0: i32, %arg1: i32, %arg2: memref<2x128xf32, #tpu.memory_space<vmem>>, %arg3: memref<128x1024xf32, #tpu.memory_space<vmem>>, %arg4: memref<1x1024xf32, #tpu.memory_space<vmem>>, %arg5: memref<1024x8xf32, #tpu.memory_space<vmem>>, %arg6: memref<1x8xf32, #tpu.memory_space<vmem>>, %arg7: memref<1x2x8xf32, #tpu.memory_space<vmem>>, %arg8: memref<2x1024xf32, #tpu.memory_space<vmem>>) attributes {dimension_semantics = [#tpu.dimension_semantics<parallel>, #tpu.dimension_semantics<arbitrary>], iteration_bounds = array<i64: 1, 2>, scalar_prefetch = 0 : i64, scratch_operands = 1 : i64, tpu.core_type = #tpu.core_type<tc>, window_params = [{transform_indices = @transform_0, window_bounds = array<i64: 2, 128>}, {transform_indices = @transform_1, window_bounds = array<i64: 128, 1024>}, {transform_indices = @transform_2, window_bounds = array<i64: 1, 1024>}, {transform_indices = @transform_3, window_bounds = array<i64: 1024, 8>}, {pipeline_mode = #tpu.pipeline_mode<synchronous>, transform_indices = @transform_4, window_bounds = array<i64: 1, 8>}, {transform_indices = @transform_5, window_bounds = array<i64: 1, 2, 8>}]} {
    %c0_i32 = arith.constant 0 : i32
    %0 = arith.cmpi eq, %arg1, %c0_i32 : i32
    %1 = arith.extui %0 : i1 to i32
    %c0_i32_0 = arith.constant 0 : i32
    %2 = arith.cmpi ne, %1, %c0_i32_0 : i32
    scf.if %2 {
      %cst_9 = arith.constant 0.000000e+00 : f32
      %12 = vector.broadcast %cst_9 : f32 to vector<2x1024xf32>
      %c0_10 = arith.constant 0 : index
      %c0_11 = arith.constant 0 : index
      %13 = vector.load %arg8[%c0_10, %c0_11] : memref<2x1024xf32, #tpu.memory_space<vmem>>, vector<2x1024xf32>
      tpu.vector_store %arg8[%c0_10, %c0_11], %12 {strides = array<i32>} : memref<2x1024xf32, #tpu.memory_space<vmem>>, vector<2x1024xf32>,
    } else {
    }
    %c0 = arith.constant 0 : index
    %c0_1 = arith.constant 0 : index
    %3 = vector.load %arg8[%c0, %c0_1] : memref<2x1024xf32, #tpu.memory_space<vmem>>, vector<2x1024xf32>
    %c0_2 = arith.constant 0 : index
    %c0_3 = arith.constant 0 : index
    %4 = vector.load %arg2[%c0_2, %c0_3] : memref<2x128xf32, #tpu.memory_space<vmem>>, vector<2x128xf32>
    %c0_4 = arith.constant 0 : index
    %c0_5 = arith.constant 0 : index
    %5 = vector.load %arg3[%c0_4, %c0_5] : memref<128x1024xf32, #tpu.memory_space<vmem>>, vector<128x1024xf32>
    %cst = arith.constant dense<0.000000e+00> : vector<2x1024xf32>
    %6 = tpu.matmul %4, %5, %cst {dimension_numbers = #tpu.dot_dimension_numbers<[1], [0], [0], [1], [0, 0, 1, 1], [], []>} : vector<2x128xf32>, vector<128x1024xf32>, vector<2x1024xf32> -> vector<2x1024xf32>
    %7 = arith.addf %3, %6 : vector<2x1024xf32>
    %c0_6 = arith.constant 0 : index
    %c0_7 = arith.constant 0 : index
    %8 = vector.load %arg8[%c0_6, %c0_7] : memref<2x1024xf32, #tpu.memory_space<vmem>>, vector<2x1024xf32>
    tpu.vector_store %arg8[%c0_6, %c0_7], %7 {strides = array<i32>} : memref<2x1024xf32, #tpu.memory_space<vmem>>, vector<2x1024xf32>,
    %c1_i32 = arith.constant 1 : i32
    %9 = arith.cmpi eq, %arg1, %c1_i32 : i32
    %10 = arith.extui %9 : i1 to i32
    %c0_i32_8 = arith.constant 0 : i32
    %11 = arith.cmpi ne, %10, %c0_i32_8 : i32
    scf.if %11 {
      %c0_9 = arith.constant 0 : index
      %c0_10 = arith.constant 0 : index
      %12 = vector.load %arg8[%c0_9, %c0_10] : memref<2x1024xf32, #tpu.memory_space<vmem>>, vector<2x1024xf32>
      %c0_11 = arith.constant 0 : index
      %c0_12 = arith.constant 0 : index
      %13 = vector.load %arg4[%c0_11, %c0_12] : memref<1x1024xf32, #tpu.memory_space<vmem>>, vector<1x1024xf32>
      %14 = vector.broadcast %13 : vector<1x1024xf32> to vector<2x1024xf32>
      %15 = arith.addf %12, %14 : vector<2x1024xf32>
      %cst_13 = arith.constant 0.000000e+00 : f32
      %16 = vector.broadcast %cst_13 : f32 to vector<2x1024xf32>
      %17 = arith.maximumf %15, %16 : vector<2x1024xf32>
      %c0_14 = arith.constant 0 : index
      %c0_15 = arith.constant 0 : index
      %18 = vector.load %arg5[%c0_14, %c0_15] : memref<1024x8xf32, #tpu.memory_space<vmem>>, vector<1024x8xf32>
      %cst_16 = arith.constant dense<0.000000e+00> : vector<2x8xf32>
      %19 = tpu.matmul %17, %18, %cst_16 {dimension_numbers = #tpu.dot_dimension_numbers<[1], [0], [0], [1], [0, 0, 1, 1], [], []>} : vector<2x1024xf32>, vector<1024x8xf32>, vector<2x8xf32> -> vector<2x8xf32>
      %c0_17 = arith.constant 0 : index
      %c0_18 = arith.constant 0 : index
      %20 = vector.load %arg6[%c0_17, %c0_18] : memref<1x8xf32, #tpu.memory_space<vmem>>, vector<1x8xf32>
      %c0_i32_19 = arith.constant 0 : i32
      %21 = arith.cmpi eq, %arg0, %c0_i32_19 : i32
      %22 = arith.extui %21 : i1 to i32
      %23 = arith.sitofp %22 : i32 to f32
      %24 = vector.broadcast %23 : f32 to vector<1x8xf32>
      %25 = arith.mulf %20, %24 : vector<1x8xf32>
      %26 = vector.broadcast %25 : vector<1x8xf32> to vector<2x8xf32>
      %27 = arith.addf %19, %26 : vector<2x8xf32>
      %c0_20 = arith.constant 0 : index
      %c0_21 = arith.constant 0 : index
      %c0_22 = arith.constant 0 : index
      %28 = vector.load %arg7[%c0_20, %c0_21, %c0_22] : memref<1x2x8xf32, #tpu.memory_space<vmem>>, vector<1x2x8xf32>
      %29 = vector.shape_cast %28 : vector<1x2x8xf32> to vector<2x8xf32>
      %30 = vector.shape_cast %27 : vector<2x8xf32> to vector<1x2x8xf32>
      tpu.vector_store %arg7[%c0_20, %c0_21, %c0_22], %30 {strides = array<i32>} : memref<1x2x8xf32, #tpu.memory_space<vmem>>, vector<1x2x8xf32>,
    } else {
    }
    return
  }
  func.func @transform_0(%arg0: i32, %arg1: i32) -> (i32, i32) {
    %c0_i32 = arith.constant 0 : i32
    %c0_i32_0 = arith.constant 0 : i32
    return %c0_i32, %arg1 : i32, i32
  }
  func.func @transform_1(%arg0: i32, %arg1: i32) -> (i32, i32) {
    %c0_i32 = arith.constant 0 : i32
    return %arg1, %arg0 : i32, i32
  }
  func.func @transform_2(%arg0: i32, %arg1: i32) -> (i32, i32) {
    %c0_i32 = arith.constant 0 : i32
    %c0_i32_0 = arith.constant 0 : i32
    return %c0_i32, %arg0 : i32, i32
  }
  func.func @transform_3(%arg0: i32, %arg1: i32) -> (i32, i32) {
    %c0_i32 = arith.constant 0 : i32
    %c0_i32_0 = arith.constant 0 : i32
    return %arg0, %c0_i32 : i32, i32
  }
  func.func @transform_4(%arg0: i32, %arg1: i32) -> (i32, i32) {
    %c0_i32 = arith.constant 0 : i32
    %c0_i32_0 = arith.constant 0 : i32
    %c0_i32_1 = arith.constant 0 : i32
    return %c0_i32, %c0_i32_0 : i32, i32
  }
  func.func @transform_5(%arg0: i32, %arg1: i32) -> (i32, i32, i32) {
    %c0_i32 = arith.constant 0 : i32
    %c0_i32_0 = arith.constant 0 : i32
    %c0_i32_1 = arith.constant 0 : i32
    return %arg0, %c0_i32, %c0_i32_0 : i32, i32, i32
  }
}

</mosaic_0001>

<bundles_post_ra>
// kernel: _forward_impl.2
= control target key start
LH: loop header
LB: loop body
LE: loop exit
PB: predicated region body
PF: predicated region fallthrough
CT: control target
= control target key end

     0   :  { %vm38_vm0 = vcmask 1043456   ;;  %vm31_vm1 = vcmask 97280   ;;  %vm112_vm2 = vcmask 1040384   ;;  %vm113_vm3 = vcmask 1042434   ;;  %s410_s7 = smov 64   ;;  %s411_s8 = smov 96   ;;  %s544_s2 = inlined_call_operand.vmem [shape: f32[12,32], index: 2, kind: input, shape index: {}]   ;;  %s545_s0 = inlined_call_operand.vmem [shape: f32[16,12], index: 0, kind: input, shape index: {}]   ;;  %s546_s3 = inlined_call_operand.vmem [shape: f32[1,32], index: 3, kind: input, shape index: {}]   ;;  %s547_s1 = inlined_call_operand.vmem [shape: f32[16,12], index: 1, kind: input, shape index: {}]   ;;  %s548_s4 = inlined_call_operand.vmem [shape: f32[96,32], index: 4, kind: input, shape index: {}]   ;;  %s549_s5 = inlined_call_operand.vmem [shape: f32[1,32], index: 5, kind: input, shape index: {}]   ;;  %s550_s6 = inlined_call_operand.vmem [shape: f32[2,256], index: 6, kind: output, shape index: {}]  }
   0x1   :  { %v26_v0 = vld [vmem:[%s544_s2 + $0x8] sm:$0xf]  ;;  %v25_v1 = vld [vmem:[%s544_s2] sm:$0xff]  ;;  %v142_v6 = vld [vmem:[%s548_s4 + $0x38] sm:$0xff]  ;;  %vm115_vm5 = vcmask 1044484   ;;  %vm117_vm7 = vcmask 1046534  }
   0x2   :  { %399 = vmatpush.msk.msra.mxu1 %vm38_vm0, %v26_v0  ;;  %v24_v2 = vld [vmem:[%s545_s0 + $0x8] sm:$0xff]  ;;  %383 = vmatpush.msk.msra.mxu0 %vm38_vm0, %v26_v0  ;;  %v23_v3 = vld [vmem:[%s545_s0] sm:$0xff]  ;;  %v141_v7 = vld [vmem:[%s548_s4 + $0x30] sm:$0xff]  ;;  %vm156_vm9 = vcmask 261120   ;;  %vm315_vm10 = vcmask 1047556   ;;  %vm364_vm11 = vcmask 523264  }
   0x3   :  { %v65_v4 = vld [vmem:[%s547_s1] sm:$0xff]  ;;  %v66_v5 = vld [vmem:[%s547_s1 + $0x8] sm:$0xff]  ;;  %173 = vmatpush.msra.mxu2 %v142_v6  ;;  %v109_v14 = vld [vmem:[%s548_s4 + $0x18] sm:$0xff]  ;;  %vm373_vm12 = vcmask 1041408   ;;  %vm376_vm13 = vcmask 519170   ;;  %vm366_vm14 = vcmask 785408  }
   0x4   :  { %400 = vmatpush.msra.mxu1 %v25_v1  ;;  %57 = vmatpush.msra.mxu0 %v25_v1  ;;  %v140_v8 = vld [vmem:[%s548_s4 + $0x28] sm:$0xff]  ;;  %v139_v9 = vld [vmem:[%s548_s4 + $0x20] sm:$0xff]  ;;  %v108_v15 = vld [vmem:[%s548_s4 + $0x10] sm:$0xff] }
   0x5   :  { %385 = vmatmul.msk.f32.vlgmr.msra.gmra.mxu1 %vm31_vm1, %v24_v2  ;;  %384 = vmatmul.msk.f32.vlgmr.msra.gmra.mxu0 %vm31_vm1, %v23_v3  ;;  %v406_v12 = vld [vmem:[%s546_s3] ss:$0 sm:$0xff]  ;;  %v107_v18 = vld [vmem:[%s548_s4 + $0x8] sm:$0xff]  ;;  %vm114_vm4 = vmor %vm112_vm2, %vm113_vm3 }
   0x6   :  { %386 = vmatpush.msk.msrb.mxu1 %vm38_vm0, %v26_v0  ;;  %174 = vmatpush.msra.mxu2 %v141_v7  ;;  %v106_v20 = vld [vmem:[%s548_s4] sm:$0xff]  ;;  %vm116_vm6 = vmor %vm114_vm4, %vm115_vm5  ;;  %v241_v48 = vld [vmem:[%s548_s4 + $0x58] sm:$0xff] }
   0x7   :  { %213 = vmatpush.msra.mxu3 %v109_v14  ;;  %vm493_vm8 = vmor %vm116_vm6, %vm117_vm7  ;;  %v240_v49 = vld [vmem:[%s548_s4 + $0x50] sm:$0xff]  ;;  %271 = vmatpush.msrb.mxu0 %v241_v48  ;;  %v239_v52 = vld [vmem:[%s548_s4 + $0x48] sm:$0xff] }
   0x8   :  { %88 = vmatpush.msrb.mxu1 %v25_v1  ;;  %175 = vmatpush.msra.mxu2 %v140_v8  ;;  %v238_v53 = vld [vmem:[%s548_s4 + $0x40] sm:$0xff]  ;;  %vm377_vm15 = vmor %vm376_vm13, %vm373_vm12 }
   0x9   :  { %214 = vmatpush.msra.mxu3 %v108_v15  ;;  %272 = vmatpush.msrb.mxu0 %v240_v49  ;;  %v407_v7 = vld [vmem:[%s549_s5] ss:$0 sm:$0xff]  ;;  %s409_s5 = smov 32  }
   0xa   :  { %176 = vmatpush.msra.mxu2 %v139_v9 }
   0xb   :  { %215 = vmatpush.msra.mxu3 %v107_v18  ;;  %273 = vmatpush.msrb.mxu0 %v239_v52 }
   0xd   :  { %387 = vmatmul.msk.f32.vlgmr.msrb.gmra.mxu1 %vm31_vm1, %v65_v4  ;;  %216 = vmatpush.msra.mxu3 %v106_v20 }
   0xe   :  { %274 = vmatpush.msrb.mxu0 %v238_v53  ;;  %v412_v53 = vmov 0.0  }
   0xf   :  { %369 = vst [vmem:[%s550_s6] sm:$0xf] %v412_v53 }
  0x15   :  { %388 = vmatmul.msk.f32.gmra.mxu1 %vm31_vm1, %v66_v5 }
  0x82   :  { %v62_v10 = vpop.f32.mrf.mxu1  ;;  %v59_v11 = vpop.f32.mrf.mxu0 }
  0x83   :  { %v60_v13 = vadd.f32 %v406_v12, %v59_v11  ;;  %v63_v24 = vadd.f32 %v406_v12, %v62_v10  ;;  %v408_v10 = vmov 1934713408  }
  0x84   :  { %v318_v11 = vunpack.c.l.s4 %v408_v10 }
  0x86   :  { %v319_v18 = vunpack.c.0.s8 %v318_v11 }
  0x8a   :  { %v90_v16 = vpop.f32.mrf.mxu1 }
  0x8b   :  { %v91_v17 = vadd.f32 %v406_v12, %v90_v16 }
  0x8d   :  { %v96_v19 = vmax.f32 %v60_v13, %v91_v17 }
  0x8f   :  { %v98_v21 = vmax.f32 %v96_v19, 0.0 }
  0x91   :  { %v102_v22 = vrot.slane %v98_v21, 2  ;;  %v103_v23 = vrot.slane %v98_v21, 4  ;;  %v389_v27 = vrot.slane %v98_v21, 9  ;;  %v390_v31 = vrot.slane %v98_v21, 13 }
  0x92   :  { %v93_v25 = vpop.f32.mrf.mxu1 }
  0x93   :  { %v121_v28 = vrot.slane %v102_v22, 7  ;;  %v124_v29 = vrot.slane %v103_v23, 7  ;;  %v94_v30 = vadd.f32 %v406_v12, %v93_v25 }
  0x95   :  { %v97_v32 = vmax.f32 %v63_v24, %v94_v30  ;;  %v122_v33 = vsel %vm493_vm8, %v389_v27, %v121_v28  ;;  %v123_v34 = vrot.slane %v121_v28, 2  ;;  %v126_v35 = vrot.slane %v124_v29, 2 }
  0x96   :  { %143 = vst [vmem:[#allocation1] ss:$4 sm:$0xff] %v122_v33 }
  0x97   :  { %v99_v36 = vmax.f32 %v97_v32, 0.0  ;;  %v125_v37 = vsel %vm493_vm8, %v123_v34, %v124_v29  ;;  %v128_v38 = vsel %vm493_vm8, %v126_v35, %v390_v31  ;;  %v299_v31 = vrot.slane %v407_v7, 4 }
  0x98   :  { %145 = vst [vmem:[#allocation1 + $0x1] ss:$4 sm:$0xff] %v125_v37 }
  0x99   :  { %v104_v39 = vrot.slane %v99_v36, 2  ;;  %147 = vst [vmem:[#allocation1 + $0x2] ss:$4 sm:$0xff] %v128_v38  ;;  %v105_v40 = vrot.slane %v99_v36, 4  ;;  %v391_v41 = vrot.slane %v99_v36, 9  ;;  %v392_v47 = vrot.slane %v99_v36, 13 }
  0x9b   :  { %v131_v42 = vrot.slane %v104_v39, 7  ;;  %v134_v43 = vrot.slane %v105_v40, 7 }
  0x9d   :  { %v132_v44 = vsel %vm493_vm8, %v391_v41, %v131_v42  ;;  %v133_v45 = vrot.slane %v131_v42, 2  ;;  %v136_v46 = vrot.slane %v134_v43, 2 }
  0x9e   :  { %149 = vst [vmem:[#allocation1 + $0x3] ss:$4 sm:$0xff] %v132_v44 }
  0x9f   :  { %v135_v50 = vsel %vm493_vm8, %v133_v45, %v134_v43  ;;  %v138_v51 = vsel %vm493_vm8, %v136_v46, %v392_v47 }
  0xa0   :  { %151 = vst [vmem:[#allocation1 + $0x20] ss:$4 sm:$0xff] %v135_v50 }
  0xa1   :  { %153 = vst [vmem:[#allocation1 + $0x21] ss:$4 sm:$0xff] %v138_v51 }
  0xa5   :  { %v154_v54 = vld.sshfl [vmem:[#allocation1] sm:$0xff pattern:$0x73625140] }
  0xa6   :  { %393 = vmatmul.msk.f32.vlgmr.msra.gmra.mxu2 %vm156_vm9, %v154_v54  ;;  %184 = vst [vmem:[#allocation1] ss:$4 sm:$0xff] %v98_v21 }
  0xa7   :  { %186 = vst [vmem:[#allocation1 + $0x1] ss:$4 sm:$0xff] %v102_v22  ;;  %v298_v22 = vrot.slane %v407_v7, 2 }
  0xa8   :  { %188 = vst [vmem:[#allocation1 + $0x2] ss:$4 sm:$0xff] %v103_v23  ;;  %v155_v55 = vld.sshfl [vmem:[#allocation1 + $0x20] sm:$0xff pattern:$0x73625140] }
  0xa9   :  { %190 = vst [vmem:[#allocation1 + $0x3] ss:$4 sm:$0xff] %v99_v36 }
  0xaa   :  { %192 = vst [vmem:[#allocation1 + $0x20] ss:$4 sm:$0xff] %v104_v39 }
  0xab   :  { %194 = vst [vmem:[#allocation1 + $0x21] ss:$4 sm:$0xff] %v105_v40 }
  0xae   :  { %394 = vmatmul.msk.f32.gmra.mxu2 %vm156_vm9, %v155_v55 }
  0xb0   :  { %v195_v56 = vld.sshfl [vmem:[#allocation1] sm:$0xff pattern:$0x73625140] }
  0xb1   :  { %395 = vmatmul.msk.f32.vlgmr.msra.gmra.mxu3 %vm156_vm9, %v195_v56  ;;  %224 = vst.sshfl [vmem:[#allocation1] sm:$0xff pattern:$0x73625140] %v98_v21 }
  0xb2   :  { %v196_v57 = vld.sshfl [vmem:[#allocation1 + $0x20] sm:$0xff pattern:$0x73625140] }
  0xb3   :  { %231 = vst.sshfl [vmem:[#allocation1 + $0x20] sm:$0xff pattern:$0x73625140] %v99_v36 }
  0xb8   :  { %v226_v58 = vld [vmem:[#allocation1 + $0x1] ss:$4 sm:$0xff]  ;;  %v228_v59 = vld [vmem:[#allocation1 + $0x2] ss:$4 sm:$0xff]  ;;  %v230_v60 = vld [vmem:[#allocation1 + $0x3] ss:$4 sm:$0xff] }
  0xb9   :  { %242 = vst [vmem:[#allocation1] ss:$4 sm:$0xff] %v226_v58  ;;  %396 = vmatmul.msk.f32.gmra.mxu3 %vm156_vm9, %v196_v57 }
  0xba   :  { %244 = vst [vmem:[#allocation1 + $0x1] ss:$4 sm:$0xff] %v228_v59  ;;  %v233_v61 = vld [vmem:[#allocation1 + $0x21] ss:$4 sm:$0xff]  ;;  %v235_v62 = vld [vmem:[#allocation1 + $0x22] ss:$4 sm:$0xff] }
  0xbb   :  { %246 = vst [vmem:[#allocation1 + $0x2] ss:$4 sm:$0xff] %v230_v60  ;;  %v237_v63 = vld [vmem:[#allocation1 + $0x23] ss:$4 sm:$0xff] }
  0xbc   :  { %248 = vst [vmem:[#allocation1 + $0x3] ss:$4 sm:$0xff] %v233_v61 }
  0xbd   :  { %250 = vst [vmem:[#allocation1 + $0x20] ss:$4 sm:$0xff] %v235_v62 }
  0xbe   :  { %252 = vst [vmem:[#allocation1 + $0x21] ss:$4 sm:$0xff] %v237_v63 }
  0xc3   :  { %v253_v0 = vld.sshfl [vmem:[#allocation1] sm:$0xff pattern:$0x73625140] }
  0xc4   :  { %397 = vmatmul.msk.f32.vlgmr.msrb.gmra.mxu0 %vm156_vm9, %v253_v0 }
  0xc5   :  { %v254_v1 = vld.sshfl [vmem:[#allocation1 + $0x20] sm:$0xff pattern:$0x73625140] }
  0xcc   :  { %398 = vmatmul.msk.f32.gmra.mxu0 %vm156_vm9, %v254_v1 }
 0x129   :  { %v178_v3 = vpop.f32.mrf.mxu2 }
 0x131   :  { %v181_v14 = vpop.f32.mrf.mxu2 }
 0x134   :  { %v218_v2 = vpop.f32.mrf.mxu3 }
 0x135   :  { %v219_v4 = vadd.f32 %v218_v2, %v178_v3 }
 0x13c   :  { %v221_v9 = vpop.f32.mrf.mxu3 }
 0x13d   :  { %v222_v15 = vadd.f32 %v221_v9, %v181_v14 }
 0x141   :  { %v276_v5 = vpop.f32.mrf.mxu0 }
 0x142   :  { %v282_v6 = vadd.f32 %v276_v5, %v219_v4 }
 0x144   :  { %v288_v8 = vrot.slane %v282_v6, 6  ;;  %v302_v12 = vadd.f32 %v407_v7, %v282_v6  ;;  %v286_v23 = vrot.slane %v282_v6, 2  ;;  %v287_v36 = vrot.slane %v282_v6, 4 }
 0x146   :  { %v305_v13 = vadd.f32 %v407_v7, %v288_v8  ;;  %v308_v19 = vmax.f32 %v302_v12, 0.0  ;;  %v303_v29 = vadd.f32 %v298_v22, %v286_v23  ;;  %v304_v39 = vadd.f32 %v299_v31, %v287_v36 }
 0x148   :  { %v311_v16 = vmax.f32 %v305_v13, 0.0  ;;  %v309_v35 = vmax.f32 %v303_v29, 0.0  ;;  %v310_v43 = vmax.f32 %v304_v39, 0.0 }
 0x149   :  { %v279_v17 = vpop.f32.mrf.mxu0 }
 0x14a   :  { %v314_v20 = vrot.slane %v311_v16, 4  ;;  %v283_v21 = vadd.f32 %v279_v17, %v222_v15 }
 0x14c   :  { %v316_v24 = vsel %vm315_vm10, %v314_v20, %v308_v19  ;;  %v306_v25 = vadd.f32 %v298_v22, %v283_v21  ;;  %v289_v27 = vrot.slane %v283_v21, 2 }
 0x14d   :  { %v320_v26 = vperm.slane %v316_v24, %v319_v18 }
 0x14e   :  { %v312_v28 = vmax.f32 %v306_v25, 0.0  ;;  %v307_v34 = vadd.f32 %v299_v31, %v289_v27 }
 0x14f   :  { %v321_v30 = vrot.slane %v320_v26, 4 }
 0x150   :  { %v323_v32 = vrot.slane %v312_v28, 4  ;;  %v313_v38 = vmax.f32 %v307_v34, 0.0 }
 0x151   :  { %v322_v33 = vsel %vm315_vm10, 0.0, %v321_v30 }
 0x152   :  { %340 = vst [vmem:[#allocation1] ss:$4 sm:$0xff] %v322_v33  ;;  %v324_v37 = vsel %vm315_vm10, %v323_v32, %v309_v35  ;;  %v331_v42 = vrot.slane %v313_v38, 4 }
 0x153   :  { %v328_v40 = vperm.slane %v324_v37, %v319_v18 }
 0x154   :  { %v332_v45 = vsel %vm315_vm10, %v331_v42, %v310_v43 }
 0x155   :  { %v329_v44 = vrot.slane %v328_v40, 4  ;;  %v336_v47 = vperm.slane %v332_v45, %v319_v18 }
 0x157   :  { %v330_v46 = vsel %vm315_vm10, 0.0, %v329_v44  ;;  %v337_v49 = vrot.slane %v336_v47, 4 }
 0x159   :  { %v341_v41 = vld.sshfl [vmem:[#allocation1] sm:$0xff pattern:$0x73625140]  ;;  %v338_v50 = vsel %vm315_vm10, 0.0, %v337_v49 }
 0x15a   :  { %342 = vrot.lane.b32.xlu0 %v341_v41, %s409_s5  ;;  %346 = vst [vmem:[#allocation1] ss:$4 sm:$0xff] %v328_v40 }
 0x161   :  { %v347_v48 = vld.sshfl [vmem:[#allocation1] sm:$0xff pattern:$0x73625140] }
 0x162   :  { %348 = vrot.lane.b32.xlu1 %v347_v48, %s410_s7  ;;  %352 = vst [vmem:[#allocation1] ss:$4 sm:$0xff] %v330_v46 }
 0x169   :  { %v353_v51 = vld.sshfl [vmem:[#allocation1] sm:$0xff pattern:$0x73625140] }
 0x16a   :  { %354 = vrot.lane.b32.xlu1 %v353_v51, %s411_s8  ;;  %358 = vst [vmem:[#allocation1] ss:$4 sm:$0xff] %v338_v50 }
 0x171   :  { %v359_v52 = vld.sshfl [vmem:[#allocation1] sm:$0xff pattern:$0x73625140] }
 0x172   :  { %360 = vrot.lane.b32.xlu0 %v359_v52, %s409_s5 }
 0x1cc   :  { %v343_v55 = vpop.permute.xlu0 %342 }
 0x1cd   :  { %v363_v58 = vsel %vm156_vm9, %v320_v26, %v343_v55 }
 0x1d4   :  { %v349_v54 = vpop.permute.xlu1 %348 }
 0x1d5   :  { %v365_v60 = vsel %vm364_vm11, %v363_v58, %v349_v54 }
 0x1dc   :  { %v355_v56 = vpop.permute.xlu1 %354 }
 0x1dd   :  { %v367_v62 = vsel %vm366_vm14, %v365_v60, %v355_v56 }
 0x1e4   :  { %v361_v57 = vpop.permute.xlu0 %360 }
 0x1e5   :  { %v368_v59 = vsel %vm156_vm9, %v336_v47, %v361_v57 }
 0x1e6   :  { %v372_v61 = vrot.slane %v368_v59, 6 }
 0x1e8   :  { %v374_v63 = vsel %vm373_vm12, %v367_v62, %v372_v61 }
 0x1e9   :  { %378 = vst.msk [vmem:[%s550_s6] sm:$0xf] %vm377_vm15, %v374_v63 }

// kernel: _forward_impl.3
= control target key start
LH: loop header
LB: loop body
LE: loop exit
PB: predicated region body
PF: predicated region fallthrough
CT: control target
= control target key end

     0   :  { %10 = vsyncpa [#allocation4], 0  ;;  %s1975_s0 = inlined_call_operand.vmem [shape: f32[2,256], index: 0, kind: input, shape index: {}]   ;;  %s1976_s1 = inlined_call_operand.hbm [shape: f32[256,1024], index: 1, kind: input, shape index: {}]   ;;  %s1977_s2 = inlined_call_operand.vmem [shape: f32[1,1024], index: 2, kind: input, shape index: {}]   ;;  %s1978_s3 = inlined_call_operand.vmem [shape: f32[1024,8], index: 3, kind: input, shape index: {}]   ;;  %s1979_s4 = inlined_call_operand.vmem [shape: f32[1,8], index: 4, kind: input, shape index: {}]   ;;  %s1980_s5 = inlined_call_operand.hbm [shape: f32[1,2,8], index: 5, kind: output, shape index: {}]  }
   0x1   :  { %12 = vsyncpa [#allocation4 + $0x1], 0 }
   0x2   :  { %13 = vsyncpa [#allocation5], 0  ;;  %s1343_s18 = smov 0   ;;  %s1345_s19 = smov 0  }
   0x3   :  { %s1347_s20 = smov 0   ;;  %s1349_s21 = smov 0  }
   0x4   :  { %s1351_s22 = smov 0   ;;  %s1353_s23 = smov 0  }
   0x5 LB: > { %s1109_s24 = sadd.s32 4294967295, %s1307_s23   ;;  %s28_s25 = sadd.s32 1, %s1303_s22  ;;  %s1307_s23 = sphi %s1353_s23, %s19_s23   ;;  %s1303_s22 = sphi %s1351_s22, %s1987_s22   ;;  %s1299_s21 = sphi %s1349_s21, %s1986_s21   ;;  %s1295_s20 = sphi %s1347_s20, %s1985_s20   ;;  %s1291_s19 = sphi %s1345_s19, %s1984_s19   ;;  %s1287_s18 = sphi %s1343_s18, %s1983_s18  }
   0x6   : > { %p29_p0 = scmp.ge.s32.totalorder %s28_s25, 2  ;;  %s66_s26 = sadd.s32 1, %s1295_s20 }
   0x7   : > { %p73_p1 = scmp.ne.s32.totalorder %s1295_s20, %s1291_s19  ;;  %p74_p2 = scmp.eq.s32.totalorder %s1307_s23, 0 }
   0x8   : > { %s1989_s25 = smov (%p29_p0, %s28_s25), 0  ;;  %p79_p4 = scmp.ne.s32.totalorder %s1291_s19, %s1287_s18 }
   0x9   : > { %p1379_p3 = por %p74_p2, %p73_p1  ;;  %s61_s28 = ssub.s32 %s1303_s22, %s1989_s25 }
   0xa   : > { %p80_p5 = scmp.eq.s32.totalorder %s1109_s24, 0  ;;  %p64_p6 = scmp.eq.s32.totalorder %s61_s28, 0 }
   0xb   : > { %p1139_p8 = scmp.lt.s32.totalorder %s1307_s23, 2  ;;  %s229_s6 = sand.u32 1, %s1295_s20  }
   0xc   : > { %p1388_p7 = por %p80_p5, %p79_p4  ;;  %s1128_s7 = sshll.u32 %s1303_s22, 10 }
   0xd   : > { %s1394_s30 = scalar_select %p64_p6, %s1295_s20, %s66_s26  }
   0xe   : > { %s1114_s8 = sshll.u32 %s229_s6, 10  ;;  %s241_s11 = scalar_lea.hbm %s1976_s1, %s1128_s7 }
   0xf   : > { %s242_s12 = sshll.u32 %s241_s11, 4  ;;  %s233_s13 = scalar_lea.vmem [#allocation3], %s1114_s8  ;;  %s243_s12 = int_to_ptr.hbm [resolvable:$true] %s242_s12 }
  0x10   : > { %s244_s14 = sshll.u32 %s233_s13, 4  ;;  %p1136_p9 = pnand %p1139_p8, %p1379_p3  ;;  %s245_s14 = int_to_ptr.vmem [resolvable:$true] %s244_s14 }
  0x11   : > { %p1118_p10 = scmp.ge.s32.totalorder %s1307_s23, 1  ;;  %p252_p11 = scmp.lt.s32.totalorder %s1307_s23, 3 }
  0x12   : > { %s230_s15 = scalar_lea.sflag [#allocation4], %s229_s6  ;;  %s1309_s16 = smov 1024  }
  0x13   : > { %s1310_s17 = smov 64   ;;  %p253_p12 = pnand %p1118_p10, %p252_p11 }
  0x14   : > { %1138 = dma.hbm_to_vmem [thread:$0]  (!%p1136_p9), %s243_s12, 16384, %s245_s14, %s230_s15, %s1309_s16, %s1309_s16, %s1310_s17  }
  0x15   : > { %256 = sbr.rel (%p253_p12) target bundleno = 451 (0x1c3), region = 40  ;;  %s258_s18 = sand.u32 (!%p253_p12), 1, %s1291_s19  }
  0x16   : > { %s1119_s26 = sshll.u32 (!%p253_p12), %s258_s18, 10  ;;  %s259_s28 = scalar_lea.sflag (!%p253_p12), [#allocation4], %s258_s18 }
  0x17   : > { %s1406_s7 = scalar_lea.vmem (!%p253_p12), [#allocation3], %s1119_s26 }
  0x1a   : > { %1278 = dma.done.wait (%p1388_p7), %s259_s28, 16384  }
  0x1b   : > { %1280 = vsyncadd (%p1388_p7), %s259_s28, 4294950912  ;;  %p298_p13 = scmp.lt.s32.totalorder %s1299_s21, 1  ;;  %p1121_p0 = scmp.ne.s32.totalorder %s1299_s21, 0 }
  0x1d   : > { %s299_s27 = scalar_select %p298_p13, %s1299_s21, 1 }
  0x1e   : > { %318 = sbr.rel (%p1121_p0) target bundleno = 38 (0x26), region = 48 }
  0x1f   : > { %s1120_s6 = sshll.u32 %s299_s27, 1 }
  0x20   : > { %s1417_s10 = scalar_lea.vmem %s1975_s0, %s1120_s6 }
  0x23   : > { %v1311_v0 = vmov 0.0  }
  0x24   : > { %319 = vst [vmem:[#allocation2] sm:$0xff] %v1311_v0 }
  0x25   : > { %320 = vst [vmem:[#allocation2 + $0x8] sm:$0xff] %v1311_v0 }
  0x26 PF: > { %v446_v1 = vld [vmem:[%s1406_s7 + $0x3d0] sm:$0xff]  ;;  %v447_v2 = vld [vmem:[%s1406_s7 + $0x3d8] sm:$0xff]  ;;  %v445_v7 = vld [vmem:[%s1406_s7 + $0x3c8] sm:$0xff]  ;;  %vm628_vm0 = vcmask 1045508   ;;  %vm626_vm1 = vcmask 1041408   ;;  %vm630_vm2 = vcmask 1043456  }
  0x27   : > { %v438_v3 = vld [vmem:[%s1406_s7 + $0x390] sm:$0xff]  ;;  %492 = vmatpush.msra.mxu2 %v446_v1  ;;  %512 = vmatpush.msra.mxu3 %v447_v2  ;;  %v439_v4 = vld [vmem:[%s1406_s7 + $0x398] sm:$0xff]  ;;  %v444_v8 = vld [vmem:[%s1406_s7 + $0x3c0] sm:$0xff]  ;;  %p1122_p1 = scmp.ne.s32.totalorder %s1299_s21, 1 }
  0x28   : > { %v430_v5 = vld [vmem:[%s1406_s7 + $0x350] sm:$0xff]  ;;  %v431_v6 = vld [vmem:[%s1406_s7 + $0x358] sm:$0xff]  ;;  %v437_v9 = vld [vmem:[%s1406_s7 + $0x388] sm:$0xff]  ;;  %472 = vmatpush.msra.mxu1 %v445_v7  ;;  %452 = vmatpush.msra.mxu0 %v444_v8 }
  0x29   : > { %493 = vmatpush.msra.mxu2 %v438_v3  ;;  %513 = vmatpush.msra.mxu3 %v439_v4  ;;  %v422_v10 = vld [vmem:[%s1406_s7 + $0x310] sm:$0xff]  ;;  %v423_v11 = vld [vmem:[%s1406_s7 + $0x318] sm:$0xff]  ;;  %v436_v12 = vld [vmem:[%s1406_s7 + $0x380] sm:$0xff] }
  0x2a   : > { %v429_v13 = vld [vmem:[%s1406_s7 + $0x348] sm:$0xff]  ;;  %v428_v14 = vld [vmem:[%s1406_s7 + $0x340] sm:$0xff]  ;;  %473 = vmatpush.msra.mxu1 %v437_v9  ;;  %v414_v15 = vld [vmem:[%s1406_s7 + $0x2d0] sm:$0xff]  ;;  %453 = vmatpush.msra.mxu0 %v436_v12 }
  0x2b   : > { %494 = vmatpush.msra.mxu2 %v430_v5  ;;  %514 = vmatpush.msra.mxu3 %v431_v6  ;;  %v415_v16 = vld [vmem:[%s1406_s7 + $0x2d8] sm:$0xff]  ;;  %v421_v17 = vld [vmem:[%s1406_s7 + $0x308] sm:$0xff]  ;;  %v420_v18 = vld [vmem:[%s1406_s7 + $0x300] sm:$0xff] }
  0x2c   : > { %474 = vmatpush.msra.mxu1 %v429_v13  ;;  %v406_v19 = vld [vmem:[%s1406_s7 + $0x290] sm:$0xff]  ;;  %v407_v20 = vld [vmem:[%s1406_s7 + $0x298] sm:$0xff]  ;;  %454 = vmatpush.msra.mxu0 %v428_v14  ;;  %v413_v21 = vld [vmem:[%s1406_s7 + $0x2c8] sm:$0xff] }
  0x2d   : > { %495 = vmatpush.msra.mxu2 %v422_v10  ;;  %515 = vmatpush.msra.mxu3 %v423_v11  ;;  %v412_v22 = vld [vmem:[%s1406_s7 + $0x2c0] sm:$0xff]  ;;  %v398_v23 = vld [vmem:[%s1406_s7 + $0x250] sm:$0xff]  ;;  %v399_v24 = vld [vmem:[%s1406_s7 + $0x258] sm:$0xff] }
  0x2e   : > { %475 = vmatpush.msra.mxu1 %v421_v17  ;;  %455 = vmatpush.msra.mxu0 %v420_v18  ;;  %v405_v25 = vld [vmem:[%s1406_s7 + $0x288] sm:$0xff]  ;;  %v404_v26 = vld [vmem:[%s1406_s7 + $0x280] sm:$0xff]  ;;  %v390_v27 = vld [vmem:[%s1406_s7 + $0x210] sm:$0xff] }
  0x2f   : > { %496 = vmatpush.msra.mxu2 %v414_v15  ;;  %516 = vmatpush.msra.mxu3 %v415_v16  ;;  %v391_v28 = vld [vmem:[%s1406_s7 + $0x218] sm:$0xff]  ;;  %v397_v29 = vld [vmem:[%s1406_s7 + $0x248] sm:$0xff]  ;;  %v396_v30 = vld [vmem:[%s1406_s7 + $0x240] sm:$0xff] }
  0x30   : > { %476 = vmatpush.msra.mxu1 %v413_v21  ;;  %456 = vmatpush.msra.mxu0 %v412_v22  ;;  %v382_v31 = vld [vmem:[%s1406_s7 + $0x1d0] sm:$0xff]  ;;  %v383_v32 = vld [vmem:[%s1406_s7 + $0x1d8] sm:$0xff]  ;;  %v389_v33 = vld [vmem:[%s1406_s7 + $0x208] sm:$0xff] }
  0x31   : > { %497 = vmatpush.msra.mxu2 %v406_v19  ;;  %517 = vmatpush.msra.mxu3 %v407_v20  ;;  %v388_v34 = vld [vmem:[%s1406_s7 + $0x200] sm:$0xff]  ;;  %v374_v35 = vld [vmem:[%s1406_s7 + $0x190] sm:$0xff]  ;;  %v375_v36 = vld [vmem:[%s1406_s7 + $0x198] sm:$0xff] }
  0x32   : > { %477 = vmatpush.msra.mxu1 %v405_v25  ;;  %457 = vmatpush.msra.mxu0 %v404_v26  ;;  %v381_v37 = vld [vmem:[%s1406_s7 + $0x1c8] sm:$0xff]  ;;  %v380_v38 = vld [vmem:[%s1406_s7 + $0x1c0] sm:$0xff]  ;;  %v366_v39 = vld [vmem:[%s1406_s7 + $0x150] sm:$0xff] }
  0x33   : > { %498 = vmatpush.msra.mxu2 %v398_v23  ;;  %518 = vmatpush.msra.mxu3 %v399_v24  ;;  %v367_v40 = vld [vmem:[%s1406_s7 + $0x158] sm:$0xff]  ;;  %v373_v41 = vld [vmem:[%s1406_s7 + $0x188] sm:$0xff]  ;;  %v372_v42 = vld [vmem:[%s1406_s7 + $0x180] sm:$0xff] }
  0x34   : > { %478 = vmatpush.msra.mxu1 %v397_v29  ;;  %458 = vmatpush.msra.mxu0 %v396_v30  ;;  %v358_v43 = vld [vmem:[%s1406_s7 + $0x110] sm:$0xff]  ;;  %v359_v44 = vld [vmem:[%s1406_s7 + $0x118] sm:$0xff]  ;;  %v365_v45 = vld [vmem:[%s1406_s7 + $0x148] sm:$0xff] }
  0x35   : > { %499 = vmatpush.msra.mxu2 %v390_v27  ;;  %519 = vmatpush.msra.mxu3 %v391_v28  ;;  %v364_v46 = vld [vmem:[%s1406_s7 + $0x140] sm:$0xff]  ;;  %v350_v47 = vld [vmem:[%s1406_s7 + $0xd0] sm:$0xff]  ;;  %v351_v48 = vld [vmem:[%s1406_s7 + $0xd8] sm:$0xff] }
  0x36   : > { %479 = vmatpush.msra.mxu1 %v389_v33  ;;  %459 = vmatpush.msra.mxu0 %v388_v34  ;;  %v357_v49 = vld [vmem:[%s1406_s7 + $0x108] sm:$0xff]  ;;  %v356_v50 = vld [vmem:[%s1406_s7 + $0x100] sm:$0xff]  ;;  %v342_v51 = vld [vmem:[%s1406_s7 + $0x90] sm:$0xff] }
  0x37   : > { %500 = vmatpush.msra.mxu2 %v382_v31  ;;  %520 = vmatpush.msra.mxu3 %v383_v32  ;;  %v343_v52 = vld [vmem:[%s1406_s7 + $0x98] sm:$0xff]  ;;  %v349_v53 = vld [vmem:[%s1406_s7 + $0xc8] sm:$0xff]  ;;  %v348_v54 = vld [vmem:[%s1406_s7 + $0xc0] sm:$0xff] }
  0x38   : > { %480 = vmatpush.msra.mxu1 %v381_v37  ;;  %460 = vmatpush.msra.mxu0 %v380_v38  ;;  %v334_v55 = vld [vmem:[%s1406_s7 + $0x50] sm:$0xff]  ;;  %v335_v56 = vld [vmem:[%s1406_s7 + $0x58] sm:$0xff]  ;;  %v341_v57 = vld [vmem:[%s1406_s7 + $0x88] sm:$0xff] }
  0x39   : > { %501 = vmatpush.msra.mxu2 %v374_v35  ;;  %521 = vmatpush.msra.mxu3 %v375_v36  ;;  %v340_v58 = vld [vmem:[%s1406_s7 + $0x80] sm:$0xff]  ;;  %v326_v59 = vld [vmem:[%s1406_s7 + $0x10] sm:$0xff]  ;;  %v327_v60 = vld [vmem:[%s1406_s7 + $0x18] sm:$0xff] }
  0x3a   : > { %481 = vmatpush.msra.mxu1 %v373_v41  ;;  %461 = vmatpush.msra.mxu0 %v372_v42  ;;  %v450_v61 = vld [vmem:[%s1406_s7 + $0x3f0] sm:$0xff]  ;;  %v451_v62 = vld [vmem:[%s1406_s7 + $0x3f8] sm:$0xff]  ;;  %v333_v63 = vld [vmem:[%s1406_s7 + $0x48] sm:$0xff] }
  0x3b   : > { %502 = vmatpush.msra.mxu2 %v366_v39  ;;  %522 = vmatpush.msra.mxu3 %v367_v40  ;;  %v332_v0 = vld [vmem:[%s1406_s7 + $0x40] sm:$0xff]  ;;  %v442_v1 = vld [vmem:[%s1406_s7 + $0x3b0] sm:$0xff]  ;;  %v443_v2 = vld [vmem:[%s1406_s7 + $0x3b8] sm:$0xff] }
  0x3c   : > { %482 = vmatpush.msra.mxu1 %v365_v45  ;;  %462 = vmatpush.msra.mxu0 %v364_v46  ;;  %v325_v3 = vld [vmem:[%s1406_s7 + $0x8] sm:$0xff]  ;;  %v324_v4 = vld [vmem:[%s1406_s7] sm:$0xff]  ;;  %v434_v5 = vld [vmem:[%s1406_s7 + $0x370] sm:$0xff] }
  0x3d   : > { %503 = vmatpush.msra.mxu2 %v358_v43  ;;  %523 = vmatpush.msra.mxu3 %v359_v44  ;;  %v435_v6 = vld [vmem:[%s1406_s7 + $0x378] sm:$0xff]  ;;  %v449_v7 = vld [vmem:[%s1406_s7 + $0x3e8] sm:$0xff]  ;;  %v448_v8 = vld [vmem:[%s1406_s7 + $0x3e0] sm:$0xff] }
  0x3e   : > { %483 = vmatpush.msra.mxu1 %v357_v49  ;;  %463 = vmatpush.msra.mxu0 %v356_v50  ;;  %v426_v9 = vld [vmem:[%s1406_s7 + $0x330] sm:$0xff]  ;;  %v427_v10 = vld [vmem:[%s1406_s7 + $0x338] sm:$0xff]  ;;  %v441_v11 = vld [vmem:[%s1406_s7 + $0x3a8] sm:$0xff] }
  0x3f   : > { %504 = vmatpush.msra.mxu2 %v350_v47  ;;  %524 = vmatpush.msra.mxu3 %v351_v48  ;;  %v440_v12 = vld [vmem:[%s1406_s7 + $0x3a0] sm:$0xff]  ;;  %v418_v13 = vld [vmem:[%s1406_s7 + $0x2f0] sm:$0xff]  ;;  %v419_v14 = vld [vmem:[%s1406_s7 + $0x2f8] sm:$0xff] }
  0x40   : > { %484 = vmatpush.msra.mxu1 %v349_v53  ;;  %464 = vmatpush.msra.mxu0 %v348_v54  ;;  %v433_v15 = vld [vmem:[%s1406_s7 + $0x368] sm:$0xff]  ;;  %v432_v16 = vld [vmem:[%s1406_s7 + $0x360] sm:$0xff]  ;;  %v410_v17 = vld [vmem:[%s1406_s7 + $0x2b0] sm:$0xff] }
  0x41   : > { %505 = vmatpush.msra.mxu2 %v342_v51  ;;  %525 = vmatpush.msra.mxu3 %v343_v52  ;;  %v411_v18 = vld [vmem:[%s1406_s7 + $0x2b8] sm:$0xff]  ;;  %v425_v19 = vld [vmem:[%s1406_s7 + $0x328] sm:$0xff]  ;;  %v424_v20 = vld [vmem:[%s1406_s7 + $0x320] sm:$0xff] }
  0x42   : > { %485 = vmatpush.msra.mxu1 %v341_v57  ;;  %465 = vmatpush.msra.mxu0 %v340_v58  ;;  %v402_v21 = vld [vmem:[%s1406_s7 + $0x270] sm:$0xff]  ;;  %v403_v22 = vld [vmem:[%s1406_s7 + $0x278] sm:$0xff]  ;;  %v417_v23 = vld [vmem:[%s1406_s7 + $0x2e8] sm:$0xff] }
  0x43   : > { %506 = vmatpush.msra.mxu2 %v334_v55  ;;  %526 = vmatpush.msra.mxu3 %v335_v56  ;;  %v416_v24 = vld [vmem:[%s1406_s7 + $0x2e0] sm:$0xff]  ;;  %v394_v25 = vld [vmem:[%s1406_s7 + $0x230] sm:$0xff]  ;;  %v395_v26 = vld [vmem:[%s1406_s7 + $0x238] sm:$0xff] }
  0x44   : > { %486 = vmatpush.msra.mxu1 %v333_v63  ;;  %466 = vmatpush.msra.mxu0 %v332_v0  ;;  %v409_v27 = vld [vmem:[%s1406_s7 + $0x2a8] sm:$0xff]  ;;  %v408_v28 = vld [vmem:[%s1406_s7 + $0x2a0] sm:$0xff]  ;;  %v386_v29 = vld [vmem:[%s1406_s7 + $0x1f0] sm:$0xff] }
  0x45   : > { %507 = vmatpush.msra.mxu2 %v326_v59  ;;  %527 = vmatpush.msra.mxu3 %v327_v60  ;;  %v387_v30 = vld [vmem:[%s1406_s7 + $0x1f8] sm:$0xff]  ;;  %v401_v31 = vld [vmem:[%s1406_s7 + $0x268] sm:$0xff]  ;;  %v400_v32 = vld [vmem:[%s1406_s7 + $0x260] sm:$0xff] }
  0x46   : > { %487 = vmatpush.msra.mxu1 %v325_v3  ;;  %467 = vmatpush.msra.mxu0 %v324_v4  ;;  %v378_v33 = vld [vmem:[%s1406_s7 + $0x1b0] sm:$0xff]  ;;  %v379_v34 = vld [vmem:[%s1406_s7 + $0x1b8] sm:$0xff]  ;;  %v393_v35 = vld [vmem:[%s1406_s7 + $0x228] sm:$0xff] }
  0x47   : > { %572 = vmatpush.msrb.mxu2 %v450_v61  ;;  %592 = vmatpush.msrb.mxu3 %v451_v62  ;;  %v392_v36 = vld [vmem:[%s1406_s7 + $0x220] sm:$0xff]  ;;  %v370_v37 = vld [vmem:[%s1406_s7 + $0x170] sm:$0xff]  ;;  %v371_v38 = vld [vmem:[%s1406_s7 + $0x178] sm:$0xff] }
  0x48   : > { %552 = vmatpush.msrb.mxu1 %v449_v7  ;;  %532 = vmatpush.msrb.mxu0 %v448_v8  ;;  %v385_v39 = vld [vmem:[%s1406_s7 + $0x1e8] sm:$0xff]  ;;  %v362_v41 = vld [vmem:[%s1406_s7 + $0x130] sm:$0xff]  ;;  %v363_v42 = vld [vmem:[%s1406_s7 + $0x138] sm:$0xff] }
  0x49   : > { %573 = vmatpush.msrb.mxu2 %v442_v1  ;;  %593 = vmatpush.msrb.mxu3 %v443_v2  ;;  %v323_v40 = vld [vmem:[%s1417_s10] sm:$0x3]  ;;  %v384_v43 = vld [vmem:[%s1406_s7 + $0x1e0] sm:$0xff]  ;;  %v354_v45 = vld [vmem:[%s1406_s7 + $0xf0] sm:$0xff] }
  0x4a   : > { %553 = vmatpush.msrb.mxu1 %v441_v11  ;;  %533 = vmatpush.msrb.mxu0 %v440_v12  ;;  %v377_v44 = vld [vmem:[%s1406_s7 + $0x1a8] sm:$0xff]  ;;  %v355_v46 = vld [vmem:[%s1406_s7 + $0xf8] sm:$0xff]  ;;  %v376_v47 = vld [vmem:[%s1406_s7 + $0x1a0] sm:$0xff] }
  0x4b   : > { %574 = vmatpush.msrb.mxu2 %v434_v5  ;;  %594 = vmatpush.msrb.mxu3 %v435_v6  ;;  %v369_v48 = vld [vmem:[%s1406_s7 + $0x168] sm:$0xff]  ;;  %v346_v49 = vld [vmem:[%s1406_s7 + $0xb0] sm:$0xff]  ;;  %v347_v50 = vld [vmem:[%s1406_s7 + $0xb8] sm:$0xff] }
  0x4c   : > { %554 = vmatpush.msrb.mxu1 %v433_v15  ;;  %534 = vmatpush.msrb.mxu0 %v432_v16  ;;  %v368_v51 = vld [vmem:[%s1406_s7 + $0x160] sm:$0xff]  ;;  %v361_v52 = vld [vmem:[%s1406_s7 + $0x128] sm:$0xff]  ;;  %v338_v53 = vld [vmem:[%s1406_s7 + $0x70] sm:$0xff] }
  0x4d   : > { %575 = vmatpush.msrb.mxu2 %v426_v9  ;;  %595 = vmatpush.msrb.mxu3 %v427_v10  ;;  %v339_v54 = vld [vmem:[%s1406_s7 + $0x78] sm:$0xff]  ;;  %v360_v55 = vld [vmem:[%s1406_s7 + $0x120] sm:$0xff]  ;;  %v353_v56 = vld [vmem:[%s1406_s7 + $0xe8] sm:$0xff] }
  0x4e   : > { %555 = vmatpush.msrb.mxu1 %v425_v19  ;;  %535 = vmatpush.msrb.mxu0 %v424_v20  ;;  %v330_v57 = vld [vmem:[%s1406_s7 + $0x30] sm:$0xff]  ;;  %v331_v58 = vld [vmem:[%s1406_s7 + $0x38] sm:$0xff]  ;;  %v352_v59 = vld [vmem:[%s1406_s7 + $0xe0] sm:$0xff] }
  0x4f   : > { %576 = vmatpush.msrb.mxu2 %v418_v13  ;;  %596 = vmatpush.msrb.mxu3 %v419_v14  ;;  %v345_v60 = vld [vmem:[%s1406_s7 + $0xa8] sm:$0xff]  ;;  %v344_v61 = vld [vmem:[%s1406_s7 + $0xa0] sm:$0xff]  ;;  %v321_v9 = vld [vmem:[#allocation2] sm:$0xff] }
  0x50   : > { %556 = vmatpush.msrb.mxu1 %v417_v23  ;;  %536 = vmatpush.msrb.mxu0 %v416_v24  ;;  %v337_v62 = vld [vmem:[%s1406_s7 + $0x68] sm:$0xff]  ;;  %v336_v63 = vld [vmem:[%s1406_s7 + $0x60] sm:$0xff] }
  0x51   : > { %577 = vmatpush.msrb.mxu2 %v410_v17  ;;  %597 = vmatpush.msrb.mxu3 %v411_v18  ;;  %v329_v0 = vld [vmem:[%s1406_s7 + $0x28] sm:$0xff]  ;;  %v328_v1 = vld [vmem:[%s1406_s7 + $0x20] sm:$0xff] }
  0x52   : > { %557 = vmatpush.msrb.mxu1 %v409_v27  ;;  %537 = vmatpush.msrb.mxu0 %v408_v28 }
  0x53   : > { %578 = vmatpush.msrb.mxu2 %v402_v21  ;;  %598 = vmatpush.msrb.mxu3 %v403_v22  ;;  %v322_v21 = vld [vmem:[#allocation2 + $0x8] sm:$0xff] }
  0x54   : > { %558 = vmatpush.msrb.mxu1 %v401_v31  ;;  %538 = vmatpush.msrb.mxu0 %v400_v32 }
  0x55   : > { %579 = vmatpush.msrb.mxu2 %v394_v25  ;;  %599 = vmatpush.msrb.mxu3 %v395_v26 }
  0x56   : > { %559 = vmatpush.msrb.mxu1 %v393_v35  ;;  %539 = vmatpush.msrb.mxu0 %v392_v36 }
  0x57   : > { %580 = vmatpush.msrb.mxu2 %v386_v29  ;;  %600 = vmatpush.msrb.mxu3 %v387_v30 }
  0x58   : > { %560 = vmatpush.msrb.mxu1 %v385_v39  ;;  %508 = vmatmul.f32.vlgmr.msra.gmra.mxu2 %v323_v40 }
  0x59   : > { %581 = vmatpush.msrb.mxu2 %v378_v33  ;;  %601 = vmatpush.msrb.mxu3 %v379_v34 }
  0x5a   : > { %528 = vmatmul.f32.vlgmr.msra.gmra.mxu3 %v323_v40  ;;  %540 = vmatpush.msrb.mxu0 %v384_v43 }
  0x5b   : > { %582 = vmatpush.msrb.mxu2 %v370_v37  ;;  %602 = vmatpush.msrb.mxu3 %v371_v38 }
  0x5c   : > { %561 = vmatpush.msrb.mxu1 %v377_v44  ;;  %541 = vmatpush.msrb.mxu0 %v376_v47 }
  0x5d   : > { %583 = vmatpush.msrb.mxu2 %v362_v41  ;;  %603 = vmatpush.msrb.mxu3 %v363_v42 }
  0x5e   : > { %562 = vmatpush.msrb.mxu1 %v369_v48  ;;  %542 = vmatpush.msrb.mxu0 %v368_v51 }
  0x5f   : > { %584 = vmatpush.msrb.mxu2 %v354_v45  ;;  %604 = vmatpush.msrb.mxu3 %v355_v46 }
  0x60   : > { %563 = vmatpush.msrb.mxu1 %v361_v52  ;;  %543 = vmatpush.msrb.mxu0 %v360_v55 }
  0x61   : > { %585 = vmatpush.msrb.mxu2 %v346_v49  ;;  %605 = vmatpush.msrb.mxu3 %v347_v50 }
  0x62   : > { %488 = vmatmul.f32.vlgmr.msra.gmra.mxu1 %v323_v40  ;;  %468 = vmatmul.f32.vlgmr.msra.gmra.mxu0 %v323_v40 }
  0x63   : > { %586 = vmatpush.msrb.mxu2 %v338_v53  ;;  %606 = vmatpush.msrb.mxu3 %v339_v54 }
  0x64   : > { %564 = vmatpush.msrb.mxu1 %v353_v56  ;;  %544 = vmatpush.msrb.mxu0 %v352_v59 }
  0x65   : > { %587 = vmatpush.msrb.mxu2 %v330_v57  ;;  %607 = vmatpush.msrb.mxu3 %v331_v58 }
  0x66   : > { %588 = vmatmul.f32.vlgmr.msrb.gmra.mxu2 %v323_v40  ;;  %608 = vmatmul.f32.vlgmr.msrb.gmra.mxu3 %v323_v40 }
  0x67   : > { %565 = vmatpush.msrb.mxu1 %v345_v60  ;;  %545 = vmatpush.msrb.mxu0 %v344_v61 }
  0x69   : > { %566 = vmatpush.msrb.mxu1 %v337_v62  ;;  %546 = vmatpush.msrb.mxu0 %v336_v63 }
  0x6b   : > { %567 = vmatpush.msrb.mxu1 %v329_v0  ;;  %547 = vmatpush.msrb.mxu0 %v328_v1 }
  0x6c   : > { %568 = vmatmul.f32.vlgmr.msrb.gmra.mxu1 %v323_v40  ;;  %548 = vmatmul.f32.vlgmr.msrb.gmra.mxu0 %v323_v40 }
  0xdb   : > { %v509_v2 = vpop.f32.mrf.mxu2 }
  0xdc   : > { %v621_v3 = vrot.slane %v509_v2, 4 }
  0xdd   : > { %v529_v5 = vpop.f32.mrf.mxu3 }
  0xde   : > { %v622_v7 = vrot.slane %v529_v5, 2 }
  0xdf   : > { %v489_v4 = vpop.f32.mrf.mxu1  ;;  %v469_v10 = vpop.f32.mrf.mxu0 }
  0xe0   : > { %v620_v6 = vrot.slane %v489_v4, 6  ;;  %v629_v8 = vsel %vm628_vm0, %v621_v3, %v622_v7 }
  0xe2   : > { %v627_v11 = vsel %vm626_vm1, %v469_v10, %v620_v6 }
  0xe3   : > { %v631_v12 = vsel %vm630_vm2, %v627_v11, %v629_v8 }
  0xe4   : > { %v637_v13 = vadd.f32 %v631_v12, %v321_v9 }
  0xe6   : > { %639 = vst [vmem:[#allocation2] sm:$0xff] %v637_v13 }
  0xe9   : > { %v589_v14 = vpop.f32.mrf.mxu2  ;;  %v569_v15 = vpop.f32.mrf.mxu1 }
  0xea   : > { %v624_v16 = vrot.slane %v589_v14, 4  ;;  %v609_v17 = vpop.f32.mrf.mxu3  ;;  %v623_v18 = vrot.slane %v569_v15, 6  ;;  %v549_v20 = vpop.f32.mrf.mxu0 }
  0xeb   : > { %v625_v19 = vrot.slane %v609_v17, 2 }
  0xec   : > { %v632_v23 = vsel %vm626_vm1, %v549_v20, %v623_v18 }
  0xed   : > { %v633_v22 = vsel %vm628_vm0, %v624_v16, %v625_v19  ;;  %644 = sbr.rel (%p1122_p1) target bundleno = 445 (0x1bd), region = 52 }
  0xee   : > { %v634_v24 = vsel %vm630_vm2, %v632_v23, %v633_v22 }
  0xef   : > { %v638_v25 = vadd.f32 %v634_v24, %v322_v21 }
  0xf1   : > { %640 = vst [vmem:[#allocation2 + $0x8] sm:$0xff] %v638_v25 }
  0xf2   : > { %v722_v26 = vld [vmem:[%s1978_s3 + $0x178] sm:$0xff]  ;;  %v721_v28 = vld [vmem:[%s1978_s3 + $0x170] sm:$0xff]  ;;  %v720_v32 = vld [vmem:[%s1978_s3 + $0x168] sm:$0xff]  ;;  %vm993_vm3 = vcmask 58368  }
  0xf3   : > { %v690_v27 = vld [vmem:[%s1978_s3 + $0x78] sm:$0xff]  ;;  %873 = vmatpush.msra.mxu2 %v722_v26  ;;  %v689_v30 = vld [vmem:[%s1978_s3 + $0x70] sm:$0xff]  ;;  %v688_v34 = vld [vmem:[%s1978_s3 + $0x68] sm:$0xff] }
  0xf4   : > { %833 = vmatpush.msra.mxu0 %v690_v27  ;;  %v738_v29 = vld [vmem:[%s1978_s3 + $0x1f8] sm:$0xff]  ;;  %v737_v33 = vld [vmem:[%s1978_s3 + $0x1f0] sm:$0xff]  ;;  %v736_v36 = vld [vmem:[%s1978_s3 + $0x1e8] sm:$0xff] }
  0xf5   : > { %v706_v31 = vld [vmem:[%s1978_s3 + $0xf8] sm:$0xff]  ;;  %893 = vmatpush.msra.mxu3 %v738_v29  ;;  %874 = vmatpush.msra.mxu2 %v721_v28  ;;  %v705_v35 = vld [vmem:[%s1978_s3 + $0xf0] sm:$0xff]  ;;  %v719_v37 = vld [vmem:[%s1978_s3 + $0x160] sm:$0xff] }
  0xf6   : > { %853 = vmatpush.msra.mxu1 %v706_v31  ;;  %834 = vmatpush.msra.mxu0 %v689_v30  ;;  %v687_v38 = vld [vmem:[%s1978_s3 + $0x60] sm:$0xff]  ;;  %v704_v39 = vld [vmem:[%s1978_s3 + $0xe8] sm:$0xff]  ;;  %v718_v42 = vld [vmem:[%s1978_s3 + $0x158] sm:$0xff] }
  0xf7   : > { %894 = vmatpush.msra.mxu3 %v737_v33  ;;  %875 = vmatpush.msra.mxu2 %v720_v32  ;;  %v735_v40 = vld [vmem:[%s1978_s3 + $0x1e0] sm:$0xff]  ;;  %v686_v43 = vld [vmem:[%s1978_s3 + $0x58] sm:$0xff]  ;;  %v717_v46 = vld [vmem:[%s1978_s3 + $0x150] sm:$0xff] }
  0xf8   : > { %854 = vmatpush.msra.mxu1 %v705_v35  ;;  %835 = vmatpush.msra.mxu0 %v688_v34  ;;  %v703_v41 = vld [vmem:[%s1978_s3 + $0xe0] sm:$0xff]  ;;  %v734_v44 = vld [vmem:[%s1978_s3 + $0x1d8] sm:$0xff]  ;;  %v685_v47 = vld [vmem:[%s1978_s3 + $0x50] sm:$0xff] }
  0xf9   : > { %895 = vmatpush.msra.mxu3 %v736_v36  ;;  %876 = vmatpush.msra.mxu2 %v719_v37  ;;  %v702_v45 = vld [vmem:[%s1978_s3 + $0xd8] sm:$0xff]  ;;  %v733_v48 = vld [vmem:[%s1978_s3 + $0x1d0] sm:$0xff]  ;;  %v716_v50 = vld [vmem:[%s1978_s3 + $0x148] sm:$0xff] }
  0xfa   : > { %855 = vmatpush.msra.mxu1 %v704_v39  ;;  %836 = vmatpush.msra.mxu0 %v687_v38  ;;  %v701_v49 = vld [vmem:[%s1978_s3 + $0xd0] sm:$0xff]  ;;  %v684_v51 = vld [vmem:[%s1978_s3 + $0x48] sm:$0xff]  ;;  %v715_v54 = vld [vmem:[%s1978_s3 + $0x140] sm:$0xff] }
  0xfb   : > { %896 = vmatpush.msra.mxu3 %v735_v40  ;;  %877 = vmatpush.msra.mxu2 %v718_v42  ;;  %v732_v52 = vld [vmem:[%s1978_s3 + $0x1c8] sm:$0xff]  ;;  %v683_v55 = vld [vmem:[%s1978_s3 + $0x40] sm:$0xff]  ;;  %v714_v58 = vld [vmem:[%s1978_s3 + $0x138] sm:$0xff] }
  0xfc   : > { %856 = vmatpush.msra.mxu1 %v703_v41  ;;  %837 = vmatpush.msra.mxu0 %v686_v43  ;;  %v700_v53 = vld [vmem:[%s1978_s3 + $0xc8] sm:$0xff]  ;;  %v731_v56 = vld [vmem:[%s1978_s3 + $0x1c0] sm:$0xff]  ;;  %v682_v59 = vld [vmem:[%s1978_s3 + $0x38] sm:$0xff] }
  0xfd   : > { %897 = vmatpush.msra.mxu3 %v734_v44  ;;  %878 = vmatpush.msra.mxu2 %v717_v46  ;;  %v699_v57 = vld [vmem:[%s1978_s3 + $0xc0] sm:$0xff]  ;;  %v730_v60 = vld [vmem:[%s1978_s3 + $0x1b8] sm:$0xff]  ;;  %v713_v62 = vld [vmem:[%s1978_s3 + $0x130] sm:$0xff] }
  0xfe   : > { %857 = vmatpush.msra.mxu1 %v702_v45  ;;  %838 = vmatpush.msra.mxu0 %v685_v47  ;;  %v698_v61 = vld [vmem:[%s1978_s3 + $0xb8] sm:$0xff]  ;;  %v681_v63 = vld [vmem:[%s1978_s3 + $0x30] sm:$0xff]  ;;  %v712_v2 = vld [vmem:[%s1978_s3 + $0x128] sm:$0xff] }
  0xff   : > { %898 = vmatpush.msra.mxu3 %v733_v48  ;;  %879 = vmatpush.msra.mxu2 %v716_v50  ;;  %v729_v0 = vld [vmem:[%s1978_s3 + $0x1b0] sm:$0xff]  ;;  %v680_v3 = vld [vmem:[%s1978_s3 + $0x28] sm:$0xff]  ;;  %v711_v6 = vld [vmem:[%s1978_s3 + $0x120] sm:$0xff] }
 0x100   : > { %858 = vmatpush.msra.mxu1 %v701_v49  ;;  %839 = vmatpush.msra.mxu0 %v684_v51  ;;  %v697_v1 = vld [vmem:[%s1978_s3 + $0xb0] sm:$0xff]  ;;  %v728_v4 = vld [vmem:[%s1978_s3 + $0x1a8] sm:$0xff]  ;;  %v679_v7 = vld [vmem:[%s1978_s3 + $0x20] sm:$0xff] }
 0x101   : > { %899 = vmatpush.msra.mxu3 %v732_v52  ;;  %880 = vmatpush.msra.mxu2 %v715_v54  ;;  %v696_v5 = vld [vmem:[%s1978_s3 + $0xa8] sm:$0xff]  ;;  %v727_v8 = vld [vmem:[%s1978_s3 + $0x1a0] sm:$0xff]  ;;  %v710_v10 = vld [vmem:[%s1978_s3 + $0x118] sm:$0xff] }
 0x102   : > { %859 = vmatpush.msra.mxu1 %v700_v53  ;;  %840 = vmatpush.msra.mxu0 %v683_v55  ;;  %v695_v9 = vld [vmem:[%s1978_s3 + $0xa0] sm:$0xff]  ;;  %v678_v11 = vld [vmem:[%s1978_s3 + $0x18] sm:$0xff]  ;;  %v709_v14 = vld [vmem:[%s1978_s3 + $0x110] sm:$0xff] }
 0x103   : > { %900 = vmatpush.msra.mxu3 %v731_v56  ;;  %881 = vmatpush.msra.mxu2 %v714_v58  ;;  %v726_v12 = vld [vmem:[%s1978_s3 + $0x198] sm:$0xff]  ;;  %v677_v15 = vld [vmem:[%s1978_s3 + $0x10] sm:$0xff]  ;;  %v708_v18 = vld [vmem:[%s1978_s3 + $0x108] sm:$0xff] }
 0x104   : > { %860 = vmatpush.msra.mxu1 %v699_v57  ;;  %841 = vmatpush.msra.mxu0 %v682_v59  ;;  %v694_v13 = vld [vmem:[%s1978_s3 + $0x98] sm:$0xff]  ;;  %v725_v16 = vld [vmem:[%s1978_s3 + $0x190] sm:$0xff]  ;;  %v676_v19 = vld [vmem:[%s1978_s3 + $0x8] sm:$0xff] }
 0x105   : > { %901 = vmatpush.msra.mxu3 %v730_v60  ;;  %882 = vmatpush.msra.mxu2 %v713_v62  ;;  %v693_v17 = vld [vmem:[%s1978_s3 + $0x90] sm:$0xff]  ;;  %v724_v20 = vld [vmem:[%s1978_s3 + $0x188] sm:$0xff]  ;;  %v707_v22 = vld [vmem:[%s1978_s3 + $0x100] sm:$0xff] }
 0x106   : > { %861 = vmatpush.msra.mxu1 %v698_v61  ;;  %842 = vmatpush.msra.mxu0 %v681_v63  ;;  %v692_v21 = vld [vmem:[%s1978_s3 + $0x88] sm:$0xff]  ;;  %v675_v23 = vld [vmem:[%s1978_s3] sm:$0xff]  ;;  %v786_v24 = vld [vmem:[%s1978_s3 + $0x378] sm:$0xff] }
 0x107   : > { %902 = vmatpush.msra.mxu3 %v729_v0  ;;  %883 = vmatpush.msra.mxu2 %v712_v2  ;;  %v723_v25 = vld [vmem:[%s1978_s3 + $0x180] sm:$0xff]  ;;  %v754_v26 = vld [vmem:[%s1978_s3 + $0x278] sm:$0xff]  ;;  %v785_v28 = vld [vmem:[%s1978_s3 + $0x370] sm:$0xff] }
 0x108   : > { %862 = vmatpush.msra.mxu1 %v697_v1  ;;  %843 = vmatpush.msra.mxu0 %v680_v3  ;;  %v802_v27 = vld [vmem:[%s1978_s3 + $0x3f8] sm:$0xff]  ;;  %v691_v29 = vld [vmem:[%s1978_s3 + $0x80] sm:$0xff]  ;;  %v753_v30 = vld [vmem:[%s1978_s3 + $0x270] sm:$0xff] }
 0x109   : > { %903 = vmatpush.msra.mxu3 %v728_v4  ;;  %884 = vmatpush.msra.mxu2 %v711_v6  ;;  %v770_v31 = vld [vmem:[%s1978_s3 + $0x2f8] sm:$0xff]  ;;  %v784_v32 = vld [vmem:[%s1978_s3 + $0x368] sm:$0xff]  ;;  %v801_v33 = vld [vmem:[%s1978_s3 + $0x3f0] sm:$0xff] }
 0x10a   : > { %863 = vmatpush.msra.mxu1 %v696_v5  ;;  %844 = vmatpush.msra.mxu0 %v679_v7  ;;  %v752_v34 = vld [vmem:[%s1978_s3 + $0x268] sm:$0xff]  ;;  %v769_v35 = vld [vmem:[%s1978_s3 + $0x2f0] sm:$0xff]  ;;  %v783_v36 = vld [vmem:[%s1978_s3 + $0x360] sm:$0xff] }
 0x10b   : > { %904 = vmatpush.msra.mxu3 %v727_v8  ;;  %885 = vmatpush.msra.mxu2 %v710_v10  ;;  %v800_v37 = vld [vmem:[%s1978_s3 + $0x3e8] sm:$0xff]  ;;  %v751_v38 = vld [vmem:[%s1978_s3 + $0x260] sm:$0xff]  ;;  %v782_v41 = vld [vmem:[%s1978_s3 + $0x358] sm:$0xff] }
 0x10c   : > { %864 = vmatpush.msra.mxu1 %v695_v9  ;;  %845 = vmatpush.msra.mxu0 %v678_v11  ;;  %v768_v39 = vld [vmem:[%s1978_s3 + $0x2e8] sm:$0xff]  ;;  %v647_v40 = vld [vmem:[%s1977_s2] sm:$0xff]  ;;  %v750_v47 = vld [vmem:[%s1978_s3 + $0x258] sm:$0xff] }
 0x10d   : > { %905 = vmatpush.msra.mxu3 %v726_v12  ;;  %886 = vmatpush.msra.mxu2 %v709_v14  ;;  %v799_v42 = vld [vmem:[%s1978_s3 + $0x3e0] sm:$0xff]  ;;  %v649_v43 = vperm.slane %v647_v40, 0  ;;  %v650_v44 = vperm.slane %v647_v40, 1  ;;  %v651_v45 = vperm.slane %v647_v40, 2  ;;  %v652_v46 = vperm.slane %v647_v40, 3  ;;  %v781_v52 = vld [vmem:[%s1978_s3 + $0x350] sm:$0xff] }
 0x10e   : > { %865 = vmatpush.msra.mxu1 %v694_v13  ;;  %846 = vmatpush.msra.mxu0 %v677_v15  ;;  %v767_v48 = vld [vmem:[%s1978_s3 + $0x2e0] sm:$0xff]  ;;  %v653_v49 = vperm.slane %v647_v40, 4  ;;  %v654_v50 = vperm.slane %v647_v40, 5  ;;  %v655_v51 = vperm.slane %v647_v40, 6  ;;  %v798_v53 = vld [vmem:[%s1978_s3 + $0x3d8] sm:$0xff]  ;;  %v749_v57 = vld [vmem:[%s1978_s3 + $0x250] sm:$0xff] }
 0x10f   : > { %906 = vmatpush.msra.mxu3 %v725_v16  ;;  %887 = vmatpush.msra.mxu2 %v708_v18  ;;  %v657_v54 = vrot.slane %v650_v44, 6  ;;  %v658_v55 = vrot.slane %v651_v45, 4  ;;  %v659_v56 = vrot.slane %v652_v46, 2  ;;  %v766_v58 = vld [vmem:[%s1978_s3 + $0x2d8] sm:$0xff]  ;;  %v645_v59 = vld [vmem:[#allocation2] sm:$0xff]  ;;  %v656_v60 = vperm.slane %v647_v40, 7 }
 0x110   : > { %866 = vmatpush.msra.mxu1 %v693_v17  ;;  %847 = vmatpush.msra.mxu0 %v676_v19  ;;  %v660_v61 = vrot.slane %v654_v50, 6  ;;  %v661_v62 = vrot.slane %v655_v51, 4  ;;  %v780_v63 = vld [vmem:[%s1978_s3 + $0x348] sm:$0xff]  ;;  %v797_v0 = vld [vmem:[%s1978_s3 + $0x3d0] sm:$0xff]  ;;  %v779_v8 = vld [vmem:[%s1978_s3 + $0x340] sm:$0xff] }
 0x111   : > { %907 = vmatpush.msra.mxu3 %v724_v20  ;;  %888 = vmatpush.msra.mxu2 %v707_v22  ;;  %v663_v1 = vsel %vm626_vm1, %v649_v43, %v657_v54  ;;  %v664_v2 = vsel %vm628_vm0, %v658_v55, %v659_v56  ;;  %v748_v3 = vld [vmem:[%s1978_s3 + $0x248] sm:$0xff]  ;;  %v765_v4 = vld [vmem:[%s1978_s3 + $0x2d0] sm:$0xff]  ;;  %v662_v6 = vrot.slane %v656_v60, 2  ;;  %v747_v12 = vld [vmem:[%s1978_s3 + $0x240] sm:$0xff] }
 0x112   : > { %867 = vmatpush.msra.mxu1 %v692_v21  ;;  %848 = vmatpush.msra.mxu0 %v675_v23  ;;  %v665_v5 = vsel %vm630_vm2, %v663_v1, %v664_v2  ;;  %v666_v7 = vsel %vm626_vm1, %v653_v49, %v660_v61  ;;  %v796_v9 = vld [vmem:[%s1978_s3 + $0x3c8] sm:$0xff]  ;;  %v646_v11 = vld [vmem:[#allocation2 + $0x8] sm:$0xff]  ;;  %v778_v15 = vld [vmem:[%s1978_s3 + $0x338] sm:$0xff] }
 0x113   : > { %953 = vmatpush.msrb.mxu2 %v786_v24  ;;  %908 = vmatpush.msra.mxu3 %v723_v25  ;;  %v671_v10 = vadd.f32 %v665_v5, %v645_v59  ;;  %v764_v13 = vld [vmem:[%s1978_s3 + $0x2c8] sm:$0xff]  ;;  %v667_v14 = vsel %vm628_vm0, %v661_v62, %v662_v6  ;;  %v795_v16 = vld [vmem:[%s1978_s3 + $0x3c0] sm:$0xff]  ;;  %v746_v19 = vld [vmem:[%s1978_s3 + $0x238] sm:$0xff] }
 0x114   : > { %913 = vmatpush.msrb.mxu0 %v754_v26  ;;  %868 = vmatpush.msra.mxu1 %v691_v29  ;;  %v668_v18 = vsel %vm630_vm2, %v666_v7, %v667_v14  ;;  %v763_v20 = vld [vmem:[%s1978_s3 + $0x2c0] sm:$0xff]  ;;  %v777_v22 = vld [vmem:[%s1978_s3 + $0x330] sm:$0xff]  ;;  %v794_v23 = vld [vmem:[%s1978_s3 + $0x3b8] sm:$0xff] }
 0x115   : > { %973 = vmatpush.msrb.mxu3 %v802_v27  ;;  %954 = vmatpush.msrb.mxu2 %v785_v28  ;;  %v673_v17 = vmax.f32 %v671_v10, 0.0  ;;  %v672_v21 = vadd.f32 %v668_v18, %v646_v11  ;;  %v745_v24 = vld [vmem:[%s1978_s3 + $0x230] sm:$0xff]  ;;  %v762_v25 = vld [vmem:[%s1978_s3 + $0x2b8] sm:$0xff]  ;;  %v776_v27 = vld [vmem:[%s1978_s3 + $0x328] sm:$0xff] }
 0x116   : > { %914 = vmatpush.msrb.mxu0 %v753_v30  ;;  %933 = vmatpush.msrb.mxu1 %v770_v31  ;;  %v793_v28 = vld [vmem:[%s1978_s3 + $0x3b0] sm:$0xff]  ;;  %v744_v29 = vld [vmem:[%s1978_s3 + $0x228] sm:$0xff]  ;;  %v775_v31 = vld [vmem:[%s1978_s3 + $0x320] sm:$0xff] }
 0x117   : > { %955 = vmatpush.msrb.mxu2 %v784_v32  ;;  %974 = vmatpush.msrb.mxu3 %v801_v33  ;;  %814 = vst [vmem:[#allocation1] ss:$4 sm:$0xff] %v673_v17  ;;  %v674_v26 = vmax.f32 %v672_v21, 0.0  ;;  %v761_v30 = vld [vmem:[%s1978_s3 + $0x2b0] sm:$0xff]  ;;  %v792_v32 = vld [vmem:[%s1978_s3 + $0x3a8] sm:$0xff]  ;;  %v743_v33 = vld [vmem:[%s1978_s3 + $0x220] sm:$0xff] }
 0x118   : > { %915 = vmatpush.msrb.mxu0 %v752_v34  ;;  %934 = vmatpush.msrb.mxu1 %v769_v35  ;;  %v760_v34 = vld [vmem:[%s1978_s3 + $0x2a8] sm:$0xff]  ;;  %v774_v35 = vld [vmem:[%s1978_s3 + $0x318] sm:$0xff]  ;;  %v741_v45 = vld [vmem:[%s1978_s3 + $0x210] sm:$0xff] }
 0x119   : > { %956 = vmatpush.msrb.mxu2 %v783_v36  ;;  %975 = vmatpush.msrb.mxu3 %v800_v37  ;;  %816 = vst [vmem:[#allocation1 + $0x20] ss:$4 sm:$0xff] %v674_v26  ;;  %v791_v36 = vld [vmem:[%s1978_s3 + $0x3a0] sm:$0xff]  ;;  %v742_v40 = vld [vmem:[%s1978_s3 + $0x218] sm:$0xff]  ;;  %v740_v49 = vld [vmem:[%s1978_s3 + $0x208] sm:$0xff] }
 0x11a   : > { %916 = vmatpush.msrb.mxu0 %v751_v38  ;;  %935 = vmatpush.msrb.mxu1 %v768_v39  ;;  %v790_v43 = vld [vmem:[%s1978_s3 + $0x398] sm:$0xff]  ;;  %v757_v50 = vld [vmem:[%s1978_s3 + $0x290] sm:$0xff]  ;;  %v771_v51 = vld [vmem:[%s1978_s3 + $0x300] sm:$0xff] }
 0x11b   : > { %957 = vmatpush.msrb.mxu2 %v782_v41  ;;  %976 = vmatpush.msrb.mxu3 %v799_v42  ;;  %v759_v41 = vld [vmem:[%s1978_s3 + $0x2a0] sm:$0xff]  ;;  %v773_v42 = vld [vmem:[%s1978_s3 + $0x310] sm:$0xff]  ;;  %v758_v46 = vld [vmem:[%s1978_s3 + $0x298] sm:$0xff] }
 0x11c   : > { %917 = vmatpush.msrb.mxu0 %v750_v47  ;;  %936 = vmatpush.msrb.mxu1 %v767_v48  ;;  %v772_v47 = vld [vmem:[%s1978_s3 + $0x308] sm:$0xff]  ;;  %v789_v48 = vld [vmem:[%s1978_s3 + $0x390] sm:$0xff]  ;;  %v739_v54 = vld [vmem:[%s1978_s3 + $0x200] sm:$0xff] }
 0x11d   : > { %958 = vmatpush.msrb.mxu2 %v781_v52  ;;  %977 = vmatpush.msrb.mxu3 %v798_v53  ;;  %v788_v52 = vld [vmem:[%s1978_s3 + $0x388] sm:$0xff]  ;;  %v787_v56 = vld [vmem:[%s1978_s3 + $0x380] sm:$0xff] }
 0x11e   : > { %918 = vmatpush.msrb.mxu0 %v749_v57  ;;  %937 = vmatpush.msrb.mxu1 %v766_v58  ;;  %v819_v37 = vld.sshfl [vmem:[#allocation1 + $0x10] sm:$0xff pattern:$0x73625140]  ;;  %v817_v38 = vld.sshfl [vmem:[#allocation1] sm:$0xff pattern:$0x73625140] }
 0x11f   : > { %959 = vmatpush.msrb.mxu2 %v780_v63  ;;  %978 = vmatpush.msrb.mxu3 %v797_v0  ;;  %v820_v39 = vld.sshfl [vmem:[#allocation1 + $0x18] sm:$0xff pattern:$0x73625140]  ;;  %v818_v44 = vld.sshfl [vmem:[#allocation1 + $0x8] sm:$0xff pattern:$0x73625140] }
 0x120   : > { %919 = vmatpush.msrb.mxu0 %v748_v3  ;;  %938 = vmatpush.msrb.mxu1 %v765_v4  ;;  %v823_v53 = vld.sshfl [vmem:[#allocation1 + $0x30] sm:$0xff pattern:$0x73625140]  ;;  %v756_v55 = vld [vmem:[%s1978_s3 + $0x288] sm:$0xff]  ;;  %v755_v59 = vld [vmem:[%s1978_s3 + $0x280] sm:$0xff] }
 0x121   : > { %960 = vmatpush.msrb.mxu2 %v779_v8  ;;  %979 = vmatpush.msrb.mxu3 %v796_v9  ;;  %v821_v57 = vld.sshfl [vmem:[#allocation1 + $0x20] sm:$0xff pattern:$0x73625140]  ;;  %v824_v58 = vld.sshfl [vmem:[#allocation1 + $0x38] sm:$0xff pattern:$0x73625140] }
 0x122   : > { %920 = vmatpush.msrb.mxu0 %v747_v12  ;;  %939 = vmatpush.msrb.mxu1 %v764_v13  ;;  %v822_v60 = vld.sshfl [vmem:[#allocation1 + $0x28] sm:$0xff pattern:$0x73625140]  ;;  %v1194_v61 = vld [vmem:[%s1979_s4] ss:$0 sm:$0xff] }
 0x123   : > { %961 = vmatpush.msrb.mxu2 %v778_v15  ;;  %980 = vmatpush.msrb.mxu3 %v795_v16 }
 0x124   : > { %921 = vmatpush.msrb.mxu0 %v746_v19  ;;  %940 = vmatpush.msrb.mxu1 %v763_v20 }
 0x125   : > { %962 = vmatpush.msrb.mxu2 %v777_v22  ;;  %981 = vmatpush.msrb.mxu3 %v794_v23 }
 0x126   : > { %922 = vmatpush.msrb.mxu0 %v745_v24  ;;  %941 = vmatpush.msrb.mxu1 %v762_v25 }
 0x127   : > { %963 = vmatpush.msrb.mxu2 %v776_v27  ;;  %982 = vmatpush.msrb.mxu3 %v793_v28 }
 0x128   : > { %923 = vmatpush.msrb.mxu0 %v744_v29  ;;  %942 = vmatpush.msrb.mxu1 %v761_v30 }
 0x129   : > { %964 = vmatpush.msrb.mxu2 %v775_v31  ;;  %983 = vmatpush.msrb.mxu3 %v792_v32 }
 0x12a   : > { %889 = vmatmul.f32.vlgmr.msra.gmra.mxu2 %v819_v37  ;;  %924 = vmatpush.msrb.mxu0 %v743_v33 }
 0x12b   : > { %943 = vmatpush.msrb.mxu1 %v760_v34  ;;  %965 = vmatpush.msrb.mxu2 %v774_v35 }
 0x12c   : > { %984 = vmatpush.msrb.mxu3 %v791_v36  ;;  %849 = vmatmul.f32.vlgmr.msra.gmra.mxu0 %v817_v38 }
 0x12d   : > { %909 = vmatmul.f32.vlgmr.msra.gmra.mxu3 %v820_v39  ;;  %925 = vmatpush.msrb.mxu0 %v742_v40 }
 0x12e   : > { %944 = vmatpush.msrb.mxu1 %v759_v41  ;;  %966 = vmatpush.msrb.mxu2 %v773_v42 }
 0x12f   : > { %985 = vmatpush.msrb.mxu3 %v790_v43  ;;  %869 = vmatmul.f32.vlgmr.msra.gmra.mxu1 %v818_v44 }
 0x130   : > { %926 = vmatpush.msrb.mxu0 %v741_v45  ;;  %945 = vmatpush.msrb.mxu1 %v758_v46 }
 0x131   : > { %967 = vmatpush.msrb.mxu2 %v772_v47  ;;  %986 = vmatpush.msrb.mxu3 %v789_v48 }
 0x132   : > { %927 = vmatpush.msrb.mxu0 %v740_v49  ;;  %946 = vmatpush.msrb.mxu1 %v757_v50 }
 0x133   : > { %968 = vmatpush.msrb.mxu2 %v771_v51  ;;  %987 = vmatpush.msrb.mxu3 %v788_v52 }
 0x134   : > { %969 = vmatmul.f32.vlgmr.msrb.gmra.mxu2 %v823_v53  ;;  %928 = vmatpush.msrb.mxu0 %v739_v54 }
 0x135   : > { %947 = vmatpush.msrb.mxu1 %v756_v55  ;;  %988 = vmatpush.msrb.mxu3 %v787_v56 }
 0x136   : > { %929 = vmatmul.f32.vlgmr.msrb.gmra.mxu0 %v821_v57  ;;  %989 = vmatmul.f32.vlgmr.msrb.gmra.mxu3 %v824_v58 }
 0x137   : > { %948 = vmatpush.msrb.mxu1 %v755_v59 }
 0x138   : > { %949 = vmatmul.f32.vlgmr.msrb.gmra.mxu1 %v822_v60 }
 0x1a9   : > { %v850_v62 = vpop.f32.mrf.mxu0 }
 0x1aa   : > { %v851_v63 = vadd.f32 %v1194_v61, %v850_v62 }
 0x1ac   : > { %v870_v0 = vpop.f32.mrf.mxu1 }
 0x1ad   : > { %v871_v1 = vadd.f32 %v870_v0, %v851_v63  ;;  %v890_v2 = vpop.f32.mrf.mxu2 }
 0x1af   : > { %v891_v3 = vadd.f32 %v890_v2, %v871_v1 }
 0x1b0   : > { %v910_v4 = vpop.f32.mrf.mxu3 }
 0x1b1   : > { %v911_v5 = vadd.f32 %v910_v4, %v891_v3 }
 0x1b3   : > { %v930_v6 = vpop.f32.mrf.mxu0 }
 0x1b4   : > { %v931_v7 = vadd.f32 %v930_v6, %v911_v5 }
 0x1b5   : > { %v950_v8 = vpop.f32.mrf.mxu1 }
 0x1b6   : > { %v951_v9 = vadd.f32 %v950_v8, %v931_v7 }
 0x1b7   : > { %v970_v10 = vpop.f32.mrf.mxu2 }
 0x1b8   : > { %v971_v11 = vadd.f32 %v970_v10, %v951_v9 }
 0x1b9   : > { %v990_v12 = vpop.f32.mrf.mxu3 }
 0x1ba   : > { %v991_v13 = vadd.f32 %v990_v12, %v971_v11 }
 0x1bc   : > { %994 = vst.msk [vmem:[#allocation6] sm:$0x3] %vm993_vm3, %v991_v13 }
 0x1bd PF: > { %p1140_p2 = scmp.eq.s32.totalorder %s1109_s24, 1  ;;  %s1005_s26 = sshll.u32 %s1980_s5, 4  ;;  %s1006_s26 = int_to_ptr.hbm [resolvable:$true] %s1005_s26 }
 0x1be   : > { %s1312_s28 = smov [#allocation6]  }
 0x1bf   : > { %s1003_s7 = sshll.u32 %s1312_s28, 4  ;;  %s1004_s7 = int_to_ptr.vmem [resolvable:$true] %s1003_s7 }
 0x1c0   : > { %1132 = dma.vmem_to_hbm [thread:$0]  (%p1140_p2), %s1004_s7, 32, %s1006_s26, [#allocation5]  }
 0x1c1   : > { %1282 = dma.done.wait (%p1140_p2), [#allocation5], 32  }
 0x1c2   : > { %1284 = vsyncadd (%p1140_p2), [#allocation5], 4294967264 }
 0x1c3 PF: > { %s19_s23 = sadd.s32 1, %s1307_s23   ;;  %s1983_s18 = smov %s1291_s19 }
 0x1c4   : > { %p16_p3 = scmp.ge.s32.totalorder %s19_s23, 4   ;;  %s1984_s19 = smov %s1295_s20 }
 0x1c5   : > { %s1985_s20 = smov %s1394_s30  ;;  %s1986_s21 = smov %s1303_s22 }
 0x1c6   : > { %s1987_s22 = smov %s1989_s25  ;;  %18 = sbr.rel (!%p16_p3) target bundleno = 5 (0x5), region = 96 }
 0x1cb   :  { %1019 = vsyncpa [#allocation4], 1 }
 0x1cc   :  { %1021 = vsyncpa [#allocation4 + $0x1], 1 }
 0x1cd   :  { %1022 = vsyncpa [#allocation5], 1 }
 0x1ce   :  { %1024 = vsyncpa [#allocation5 + $0x1], 1 }

</bundles_post_ra>
